<compile_context>
chip_gen: v6e
topology: v6e:2x2x1
jax: 0.10.0
libtpu: 0.0.40
codegen_flags: <defaults>
</compile_context>

<pallas_src>
import jax
import jax.numpy as jnp
from jax.experimental import pallas as pl
from jax.experimental.pallas import tpu as pltpu

NEG_INF = -1e30  # finite "-inf" so padded rows never create NaNs


def _round_up(x, m):
    return ((x + m - 1) // m) * m


def _make_gated_attention_kernel(n_valid, tile_n, d_dim, mask_rows):
    """Builds the streaming kernel body (static shapes closed over)."""

    def kernel(
        x_ref,                       # (T, F)   bf16  streamed instance tile
        w1_ref, b1_ref,              # (F, 256) bf16, (1, 256) f32
        w2_ref, b2_ref,              # (256, L) bf16, (1, L)   f32
        wvu_ref, bvu_ref,            # (L, 2D)  bf16, (1, 2D)  f32  (fused Wv|Wu)
        wwr_ref, bw_ref,             # (1, D)   f32,  (1, 1)   f32
        wc_ref, bc_ref,              # (L, C)   f32,  (1, C)   f32
        y_ref,                       # (1, C)   f32   classifier out (epilogue)
        a_ref,                       # (Npad,1) f32   attention weights (resident)
        m_scr, s_scr, acc_scr,       # VMEM scratch: (1,1),(1,1),(1,L) f32
    ):
        i = pl.program_id(0)

        @pl.when(i == 0)
        def _init():
            m_scr[...] = jnp.full_like(m_scr, NEG_INF)
            s_scr[...] = jnp.zeros_like(s_scr)
            acc_scr[...] = jnp.zeros_like(acc_scr)

        # ---- feature extractor: Linear -> ReLU -> Linear -> ReLU -----------
        x = x_ref[...]                                                  # bf16
        h1 = jnp.dot(x, w1_ref[...],
                     preferred_element_type=jnp.float32) + b1_ref[...]
        h1 = jnp.maximum(h1, 0.0)                                       # (T,256)
        h = jnp.dot(h1.astype(jnp.bfloat16), w2_ref[...],
                    preferred_element_type=jnp.float32) + b2_ref[...]
        h = jnp.maximum(h, 0.0)                                         # (T,L) f32

        # ---- gated attention: fused 128-lane V|U projection -----------------
        g = jnp.dot(h.astype(jnp.bfloat16), wvu_ref[...],
                    preferred_element_type=jnp.float32) + bvu_ref[...]  # (T,2D)
        gate = jnp.tanh(g[:, :d_dim]) * jax.nn.sigmoid(g[:, d_dim:])    # (T,D)

        # width-1 attention head as VPU multiply + lane reduction (MXU stays free)
        score = jnp.sum(gate * wwr_ref[...], axis=-1,
                        keepdims=True) + bw_ref[...]                    # (T,1)

        if mask_rows:  # mask the zero-padded rows of the last tile
            row = i * tile_n + jax.lax.broadcasted_iota(
                jnp.int32, (tile_n, 1), 0)
            score = jnp.where(row < n_valid, score, NEG_INF)

        # stash raw logits in the resident attention output; normalized in the
        # epilogue once the global softmax statistics are known
        row0 = pl.multiple_of(i * tile_n, tile_n)
        a_ref[pl.ds(row0, tile_n), :] = score

        # ---- online softmax + attention-weighted pooling ---------------------
        tile_max = jnp.max(score, axis=0, keepdims=True)                # (1,1)
        m_new = jnp.maximum(m_scr[...], tile_max)
        alpha = jnp.exp(m_scr[...] - m_new)                             # (1,1)
        e = jnp.exp(score - m_new)                                      # (T,1)
        s_scr[...] = alpha * s_scr[...] + jnp.sum(e, axis=0, keepdims=True)
        # M=1 pooling matmul -> VPU broadcast-multiply + sublane reduction
        acc_scr[...] = alpha * acc_scr[...] + jnp.sum(e * h, axis=0,
                                                      keepdims=True)    # (1,L)
        m_scr[...] = m_new

        @pl.when(i == pl.num_programs(0) - 1)
        def _epilogue():
            inv_s = pl.reciprocal(s_scr[...], approx=True)              # (1,1)
            mfeat = acc_scr[...] * inv_s                                # (1,L)
            y = jnp.dot(mfeat, wc_ref[...],
                        preferred_element_type=jnp.float32) + bc_ref[...]
            y_ref[...] = y.astype(y_ref.dtype)
            # global softmax normalization of the stashed logits; padded rows
            # hold NEG_INF so they normalize to exactly 0
            a_ref[...] = jnp.exp(a_ref[...] - m_scr[...]) * inv_s

    return kernel


def gated_attention_forward(x, params, tile_n=512):
    """x: (N, in_features) float32. params: dict from init_params."""
    N, F = x.shape
    C = params["wc"].shape[1]
    L = params["w2"].shape[1]
    D = params["wv"].shape[1]

    # ---- tile selection (blocks must be 8/128-aligned or full-dim) ----------
    if N <= tile_n:
        tile = _round_up(max(N, 1), 8)           # single tile == full padded N
    else:
        tile = max(128, (tile_n // 128) * 128)   # multi-tile => 128-aligned
    n_pad = _round_up(N, tile)
    grid = n_pad // tile

    # ---- parameter prep: bf16 MXU weights, fused V|U projection -------------
    bf16, f32 = jnp.bfloat16, jnp.float32
    w1 = params["w1"].astype(bf16)
    w2 = params["w2"].astype(bf16)
    wvu = jnp.concatenate([params["wv"], params["wu"]], axis=1).astype(bf16)
    bvu = jnp.concatenate([params["bv"], params["bu"]], axis=1).astype(f32)
    wwr = params["ww"].astype(f32).T                 # (1, D)
    bw = params["bw"].astype(f32).reshape(1, 1)
    b1 = params["b1"].astype(f32)
    b2 = params["b2"].astype(f32)
    wc = params["wc"].astype(f32)                    # tiny, epilogue only
    bc = params["bc"].astype(f32)

    x_b = x.astype(bf16)
    if n_pad != N:
        x_b = jnp.pad(x_b, ((0, n_pad - N), (0, 0)))

    def _full_spec(arr):
        nd = arr.ndim
        return pl.BlockSpec(arr.shape, lambda i, _nd=nd: (0,) * _nd)

    in_specs = [
        pl.BlockSpec((tile, F), lambda i: (i, 0)),   # x stream
        _full_spec(w1), _full_spec(b1),
        _full_spec(w2), _full_spec(b2),
        _full_spec(wvu), _full_spec(bvu),
        _full_spec(wwr), _full_spec(bw),
        _full_spec(wc), _full_spec(bc),
    ]
    out_specs = [
        pl.BlockSpec((1, C), lambda i: (0, 0)),      # Y_prob (epilogue)
        pl.BlockSpec((n_pad, 1), lambda i: (0, 0)),  # attention weights (resident)
    ]
    out_shape = (
        jax.ShapeDtypeStruct((1, C), f32),
        jax.ShapeDtypeStruct((n_pad, 1), f32),
    )

    # Rough VMEM footprint: double-buffered bf16 x stream + f32 intermediates
    # + resident weights + resident attention column.  Only raise the scoped
    # VMEM limit when needed so the same code stays within v7x's smaller
    # (64 MiB physical) VMEM.
    est = 2 * tile * F * 2                                # x double buffer
    est += tile * (256 + L + 2 * D + 8) * 4               # f32 intermediates
    est += (F * 256 + 256 * L + L * 2 * D) * 2            # bf16 weights
    est += (L * C + n_pad + 4096) * 4                     # f32 weights + A column
    vmem_limit = None
    if est > 24 * 1024 * 1024:
        vmem_limit = int(min(max(2 * est, 32 * 1024 * 1024), 64 * 1024 * 1024))

    kernel = _make_gated_attention_kernel(
        n_valid=N, tile_n=tile, d_dim=D, mask_rows=(n_pad != N))

    y_prob, a_col = pl.pallas_call(
        kernel,
        out_shape=out_shape,
        grid_spec=pltpu.PrefetchScalarGridSpec(
            num_scalar_prefetch=0,
            grid=(grid,),
            in_specs=in_specs,
            out_specs=out_specs,
            scratch_shapes=[
                pltpu.VMEM((1, 1), f32),      # running max m
                pltpu.VMEM((1, 1), f32),      # running sum s
                pltpu.VMEM((1, L), f32),      # pooled-feature accumulator
            ],
        ),
        compiler_params=pltpu.CompilerParams(
            dimension_semantics=("arbitrary",),
            vmem_limit_bytes=vmem_limit,
        ),
    )(x_b, w1, b1, w2, b2, wvu, bvu, wwr, bw, wc, bc)

    # Final (N,1) -> (1,N) relayout of N floats done outside the hot loop.
    a = a_col[:N, 0][None, :]
    # TODO(synk): on v7x a further win is splitting the bag across the 2
    # TensorCores (core-parallel leading grid axis + log-sum-exp merge).
    return y_prob, a


def init_params(key, in_features, num_class, L=128, D=64):
    """Deterministic synthetic parameter init (shapes follow the nn.Module)."""
    keys = jax.random.split(key, 12)

    def lin(kw, kb, d_in, d_out):
        scale = 1.0 / jnp.sqrt(jnp.float32(d_in))
        w = jax.random.uniform(kw, (d_in, d_out), jnp.float32, -scale, scale)
        b = jax.random.uniform(kb, (1, d_out), jnp.float32, -scale, scale)
        return w, b

    w1, b1 = lin(keys[0], keys[1], in_features, 256)
    w2, b2 = lin(keys[2], keys[3], 256, L)
    wv, bv = lin(keys[4], keys[5], L, D)
    wu, bu = lin(keys[6], keys[7], L, D)
    ww, bw = lin(keys[8], keys[9], D, 1)
    wc, bc = lin(keys[10], keys[11], L * 1, num_class)
    return dict(w1=w1, b1=b1, w2=w2, b2=b2, wv=wv, bv=bv, wu=wu, bu=bu,
                ww=ww, bw=bw, wc=wc, bc=bc)


def reference_forward(x, p):
    """Pure-JAX reference mirroring the PyTorch forward (and the kernel's
    bf16 rounding of MXU inputs, with exact f32 accumulation)."""
    f32 = jnp.float32
    hp = jax.lax.Precision.HIGHEST

    def q(a):  # mirror bf16 quantization of matmul inputs
        return a.astype(jnp.bfloat16).astype(f32)

    xq = q(x)
    h = jnp.maximum(jnp.dot(xq, q(p["w1"]), precision=hp) + p["b1"], 0.0)
    h = jnp.maximum(jnp.dot(q(h), q(p["w2"]), precision=hp) + p["b2"], 0.0)
    hq = q(h)
    a_v = jnp.tanh(jnp.dot(hq, q(p["wv"]), precision=hp) + p["bv"])
    a_u = jax.nn.sigmoid(jnp.dot(hq, q(p["wu"]), precision=hp) + p["bu"])
    a = jnp.dot(a_v * a_u, p["ww"], precision=hp) + p["bw"]   # (N, 1)
    a = a.T                                                   # (1, N)
    a = jax.nn.softmax(a, axis=1)
    m = jnp.dot(a, h, precision=hp)                           # (1, L)
    y = jnp.dot(m, p["wc"], precision=hp) + p["bc"]
    return y, a


if __name__ == "__main__":
    in_features = 32
    num_class = 4

    key = jax.random.PRNGKey(0)
    kx, kp = jax.random.split(key)
    params = init_params(kp, in_features, num_class)

    # Case 1: multi-tile bag (exercises the online softmax across 3 tiles,
    # last-tile row masking, and the streaming accumulator).
    n_instances = 300
    x = jax.random.normal(kx, (n_instances, in_features), jnp.float32)
    y_prob, a = gated_attention_forward(x, params, tile_n=128)
    y_prob, a = jax.block_until_ready((y_prob, a))

    y_ref, a_ref = reference_forward(x, params)
    assert y_prob.shape == (1, num_class) and a.shape == (1, n_instances)
    assert jnp.allclose(y_prob, y_ref, atol=5e-3, rtol=5e-3)
    assert jnp.allclose(a, a_ref, atol=5e-3, rtol=5e-3)
    assert jnp.allclose(jnp.sum(a), 1.0, atol=1e-2)

    # Case 2: tiny single-tile bag (grid of 1, no padding).
    x_small = jax.random.normal(kx, (8, in_features), jnp.float32)
    y2, a2 = gated_attention_forward(x_small, params)
    y2, a2 = jax.block_until_ready((y2, a2))
    y2_ref, a2_ref = reference_forward(x_small, params)
    assert y2.shape == (1, num_class) and a2.shape == (1, 8)
    assert jnp.allclose(y2, y2_ref, atol=5e-3, rtol=5e-3)
    assert jnp.allclose(a2, a2_ref, atol=5e-3, rtol=5e-3)

    print("KERNEL_OK")
</pallas_src>

<mosaic_0001>
module attributes {stable_mosaic.version = 11 : i64} {
  func.func @kernel(%arg0: i32, %arg1: memref<128x32xbf16, #tpu.memory_space<vmem>>, %arg2: memref<32x256xbf16, #tpu.memory_space<vmem>>, %arg3: memref<1x256xf32, #tpu.memory_space<vmem>>, %arg4: memref<256x128xbf16, #tpu.memory_space<vmem>>, %arg5: memref<1x128xf32, #tpu.memory_space<vmem>>, %arg6: memref<128x128xbf16, #tpu.memory_space<vmem>>, %arg7: memref<1x128xf32, #tpu.memory_space<vmem>>, %arg8: memref<1x64xf32, #tpu.memory_space<vmem>>, %arg9: memref<1x1xf32, #tpu.memory_space<vmem>>, %arg10: memref<128x4xf32, #tpu.memory_space<vmem>>, %arg11: memref<1x4xf32, #tpu.memory_space<vmem>>, %arg12: memref<1x4xf32, #tpu.memory_space<vmem>>, %arg13: memref<384x1xf32, #tpu.memory_space<vmem>>, %arg14: memref<1x1xf32, #tpu.memory_space<vmem>>, %arg15: memref<1x1xf32, #tpu.memory_space<vmem>>, %arg16: memref<1x128xf32, #tpu.memory_space<vmem>>) attributes {dimension_semantics = [#tpu.dimension_semantics<arbitrary>], iteration_bounds = array<i64: 3>, scalar_prefetch = 0 : i64, scratch_operands = 3 : i64, tpu.core_type = #tpu.core_type<tc>, window_params = [{transform_indices = @transform_0, window_bounds = array<i64: 128, 32>}, {pipeline_mode = #tpu.pipeline_mode<synchronous>, transform_indices = @transform_1, window_bounds = array<i64: 32, 256>}, {pipeline_mode = #tpu.pipeline_mode<synchronous>, transform_indices = @transform_2, window_bounds = array<i64: 1, 256>}, {pipeline_mode = #tpu.pipeline_mode<synchronous>, transform_indices = @transform_3, window_bounds = array<i64: 256, 128>}, {pipeline_mode = #tpu.pipeline_mode<synchronous>, transform_indices = @transform_4, window_bounds = array<i64: 1, 128>}, {pipeline_mode = #tpu.pipeline_mode<synchronous>, transform_indices = @transform_5, window_bounds = array<i64: 128, 128>}, {pipeline_mode = #tpu.pipeline_mode<synchronous>, transform_indices = @transform_6, window_bounds = array<i64: 1, 128>}, {pipeline_mode = #tpu.pipeline_mode<synchronous>, transform_indices = @transform_7, window_bounds = array<i64: 1, 64>}, {pipeline_mode = #tpu.pipeline_mode<synchronous>, transform_indices = @transform_8, window_bounds = array<i64: 1, 1>}, {pipeline_mode = #tpu.pipeline_mode<synchronous>, transform_indices = @transform_9, window_bounds = array<i64: 128, 4>}, {pipeline_mode = #tpu.pipeline_mode<synchronous>, transform_indices = @transform_10, window_bounds = array<i64: 1, 4>}, {pipeline_mode = #tpu.pipeline_mode<synchronous>, transform_indices = @transform_11, window_bounds = array<i64: 1, 4>}, {pipeline_mode = #tpu.pipeline_mode<synchronous>, transform_indices = @transform_12, window_bounds = array<i64: 384, 1>}]} {
    %c0_i32 = arith.constant 0 : i32
    %0 = arith.cmpi eq, %arg0, %c0_i32 : i32
    %1 = arith.extui %0 : i1 to i32
    %c0_i32_0 = arith.constant 0 : i32
    %2 = arith.cmpi ne, %1, %c0_i32_0 : i32
    scf.if %2 {
      %cst_45 = arith.constant -1.000000e+30 : f32
      %83 = vector.broadcast %cst_45 : f32 to vector<1x1xf32>
      %c0_46 = arith.constant 0 : index
      %c0_47 = arith.constant 0 : index
      %84 = vector.load %arg14[%c0_46, %c0_47] : memref<1x1xf32, #tpu.memory_space<vmem>>, vector<1x1xf32>
      tpu.vector_store %arg14[%c0_46, %c0_47], %83 {strides = array<i32>} : memref<1x1xf32, #tpu.memory_space<vmem>>, vector<1x1xf32>,
      %cst_48 = arith.constant 0.000000e+00 : f32
      %85 = vector.broadcast %cst_48 : f32 to vector<1x1xf32>
      %c0_49 = arith.constant 0 : index
      %c0_50 = arith.constant 0 : index
      %86 = vector.load %arg15[%c0_49, %c0_50] : memref<1x1xf32, #tpu.memory_space<vmem>>, vector<1x1xf32>
      tpu.vector_store %arg15[%c0_49, %c0_50], %85 {strides = array<i32>} : memref<1x1xf32, #tpu.memory_space<vmem>>, vector<1x1xf32>,
      %cst_51 = arith.constant 0.000000e+00 : f32
      %87 = vector.broadcast %cst_51 : f32 to vector<1x128xf32>
      %c0_52 = arith.constant 0 : index
      %c0_53 = arith.constant 0 : index
      %88 = vector.load %arg16[%c0_52, %c0_53] : memref<1x128xf32, #tpu.memory_space<vmem>>, vector<1x128xf32>
      tpu.vector_store %arg16[%c0_52, %c0_53], %87 {strides = array<i32>} : memref<1x128xf32, #tpu.memory_space<vmem>>, vector<1x128xf32>,
    } else {
    }
    %c0 = arith.constant 0 : index
    %c0_1 = arith.constant 0 : index
    %3 = vector.load %arg1[%c0, %c0_1] : memref<128x32xbf16, #tpu.memory_space<vmem>>, vector<128x32xbf16>
    %c0_2 = arith.constant 0 : index
    %c0_3 = arith.constant 0 : index
    %4 = vector.load %arg2[%c0_2, %c0_3] : memref<32x256xbf16, #tpu.memory_space<vmem>>, vector<32x256xbf16>
    %cst = arith.constant dense<0.000000e+00> : vector<128x256xf32>
    %5 = tpu.matmul %3, %4, %cst {dimension_numbers = #tpu.dot_dimension_numbers<[1], [0], [0], [1], [0, 0, 1, 1], [], []>} : vector<128x32xbf16>, vector<32x256xbf16>, vector<128x256xf32> -> vector<128x256xf32>
    %c0_4 = arith.constant 0 : index
    %c0_5 = arith.constant 0 : index
    %6 = vector.load %arg3[%c0_4, %c0_5] : memref<1x256xf32, #tpu.memory_space<vmem>>, vector<1x256xf32>
    %7 = vector.broadcast %6 : vector<1x256xf32> to vector<128x256xf32>
    %8 = arith.addf %5, %7 : vector<128x256xf32>
    %cst_6 = arith.constant 0.000000e+00 : f32
    %9 = vector.broadcast %cst_6 : f32 to vector<128x256xf32>
    %10 = arith.maximumf %8, %9 : vector<128x256xf32>
    %11 = arith.truncf %10 : vector<128x256xf32> to vector<128x256xbf16>
    %c0_7 = arith.constant 0 : index
    %c0_8 = arith.constant 0 : index
    %12 = vector.load %arg4[%c0_7, %c0_8] : memref<256x128xbf16, #tpu.memory_space<vmem>>, vector<256x128xbf16>
    %cst_9 = arith.constant dense<0.000000e+00> : vector<128x128xf32>
    %13 = tpu.matmul %11, %12, %cst_9 {dimension_numbers = #tpu.dot_dimension_numbers<[1], [0], [0], [1], [0, 0, 1, 1], [], []>} : vector<128x256xbf16>, vector<256x128xbf16>, vector<128x128xf32> -> vector<128x128xf32>
    %c0_10 = arith.constant 0 : index
    %c0_11 = arith.constant 0 : index
    %14 = vector.load %arg5[%c0_10, %c0_11] : memref<1x128xf32, #tpu.memory_space<vmem>>, vector<1x128xf32>
    %15 = vector.broadcast %14 : vector<1x128xf32> to vector<128x128xf32>
    %16 = arith.addf %13, %15 : vector<128x128xf32>
    %cst_12 = arith.constant 0.000000e+00 : f32
    %17 = vector.broadcast %cst_12 : f32 to vector<128x128xf32>
    %18 = arith.maximumf %16, %17 : vector<128x128xf32>
    %19 = arith.truncf %18 : vector<128x128xf32> to vector<128x128xbf16>
    %c0_13 = arith.constant 0 : index
    %c0_14 = arith.constant 0 : index
    %20 = vector.load %arg6[%c0_13, %c0_14] : memref<128x128xbf16, #tpu.memory_space<vmem>>, vector<128x128xbf16>
    %cst_15 = arith.constant dense<0.000000e+00> : vector<128x128xf32>
    %21 = tpu.matmul %19, %20, %cst_15 {dimension_numbers = #tpu.dot_dimension_numbers<[1], [0], [0], [1], [0, 0, 1, 1], [], []>} : vector<128x128xbf16>, vector<128x128xbf16>, vector<128x128xf32> -> vector<128x128xf32>
    %c0_16 = arith.constant 0 : index
    %c0_17 = arith.constant 0 : index
    %22 = vector.load %arg7[%c0_16, %c0_17] : memref<1x128xf32, #tpu.memory_space<vmem>>, vector<1x128xf32>
    %23 = vector.broadcast %22 : vector<1x128xf32> to vector<128x128xf32>
    %24 = arith.addf %21, %23 : vector<128x128xf32>
    %25 = vector.extract_strided_slice %24 {offsets = [0, 0], sizes = [128, 64], strides = [1, 1]} : vector<128x128xf32> to vector<128x64xf32>
    %26 = math.tanh %25 : vector<128x64xf32>
    %27 = vector.extract_strided_slice %24 {offsets = [0, 64], sizes = [128, 64], strides = [1, 1]} : vector<128x128xf32> to vector<128x64xf32>
    %28 = arith.negf %27 : vector<128x64xf32>
    %29 = math.exp %28 : vector<128x64xf32>
    %cst_18 = arith.constant 1.000000e+00 : f32
    %30 = vector.broadcast %cst_18 : f32 to vector<128x64xf32>
    %31 = arith.addf %30, %29 : vector<128x64xf32>
    %32 = arith.divf %30, %31 : vector<128x64xf32>
    %33 = arith.mulf %26, %32 : vector<128x64xf32>
    %c0_19 = arith.constant 0 : index
    %c0_20 = arith.constant 0 : index
    %34 = vector.load %arg8[%c0_19, %c0_20] : memref<1x64xf32, #tpu.memory_space<vmem>>, vector<1x64xf32>
    %35 = vector.broadcast %34 : vector<1x64xf32> to vector<128x64xf32>
    %36 = arith.mulf %33, %35 : vector<128x64xf32>
    %cst_21 = arith.constant dense<0.000000e+00> : vector<128xf32>
    %37 = vector.multi_reduction <add>, %36, %cst_21 [1] : vector<128x64xf32> to vector<128xf32>
    %38 = vector.shape_cast %37 : vector<128xf32> to vector<128x1xf32>
    %c0_22 = arith.constant 0 : index
    %c0_23 = arith.constant 0 : index
    %39 = vector.load %arg9[%c0_22, %c0_23] : memref<1x1xf32, #tpu.memory_space<vmem>>, vector<1x1xf32>
    %40 = vector.broadcast %39 : vector<1x1xf32> to vector<128x1xf32>
    %41 = arith.addf %38, %40 : vector<128x1xf32>
    %c128_i32 = arith.constant 128 : i32
    %42 = arith.muli %arg0, %c128_i32 : i32
    %43 = tpu.iota {dimensions = array<i32: 0>} : vector<128x1xi32>
    %44 = vector.broadcast %42 : i32 to vector<128x1xi32>
    %45 = arith.addi %44, %43 : vector<128x1xi32>
    %c300_i32 = arith.constant 300 : i32
    %46 = vector.broadcast %c300_i32 : i32 to vector<128x1xi32>
    %47 = arith.cmpi slt, %45, %46 : vector<128x1xi32>
    %cst_24 = arith.constant -1.000000e+30 : f32
    %48 = vector.broadcast %cst_24 : f32 to vector<128x1xf32>
    %49 = arith.select %47, %41, %48 : vector<128x1xi1>, vector<128x1xf32>
    %c128_i32_25 = arith.constant 128 : i32
    %50 = arith.muli %arg0, %c128_i32_25 : i32
    %51 = tpu.assume_multiple %50, 128 : i32
    %52 = arith.index_cast %51 : i32 to index
    %c0_26 = arith.constant 0 : index
    %53 = vector.load %arg13[%52, %c0_26] : memref<384x1xf32, #tpu.memory_space<vmem>>, vector<128x1xf32>
    tpu.vector_store %arg13[%52, %c0_26], %49 {strides = array<i32>} : memref<384x1xf32, #tpu.memory_space<vmem>>, vector<128x1xf32>,
    %cst_27 = arith.constant dense<0xFF800000> : vector<1xf32>
    %54 = vector.multi_reduction <maximumf>, %49, %cst_27 [0] : vector<128x1xf32> to vector<1xf32>
    %55 = vector.shape_cast %54 : vector<1xf32> to vector<1x1xf32>
    %c0_28 = arith.constant 0 : index
    %c0_29 = arith.constant 0 : index
    %56 = vector.load %arg14[%c0_28, %c0_29] : memref<1x1xf32, #tpu.memory_space<vmem>>, vector<1x1xf32>
    %57 = arith.maximumf %56, %55 : vector<1x1xf32>
    %c0_30 = arith.constant 0 : index
    %c0_31 = arith.constant 0 : index
    %58 = vector.load %arg14[%c0_30, %c0_31] : memref<1x1xf32, #tpu.memory_space<vmem>>, vector<1x1xf32>
    %59 = arith.subf %58, %57 : vector<1x1xf32>
    %60 = math.exp %59 : vector<1x1xf32>
    %61 = vector.broadcast %57 : vector<1x1xf32> to vector<128x1xf32>
    %62 = arith.subf %49, %61 : vector<128x1xf32>
    %63 = math.exp %62 : vector<128x1xf32>
    %c0_32 = arith.constant 0 : index
    %c0_33 = arith.constant 0 : index
    %64 = vector.load %arg15[%c0_32, %c0_33] : memref<1x1xf32, #tpu.memory_space<vmem>>, vector<1x1xf32>
    %65 = arith.mulf %60, %64 : vector<1x1xf32>
    %cst_34 = arith.constant dense<0.000000e+00> : vector<1xf32>
    %66 = vector.multi_reduction <add>, %63, %cst_34 [0] : vector<128x1xf32> to vector<1xf32>
    %67 = vector.shape_cast %66 : vector<1xf32> to vector<1x1xf32>
    %68 = arith.addf %65, %67 : vector<1x1xf32>
    %c0_35 = arith.constant 0 : index
    %c0_36 = arith.constant 0 : index
    %69 = vector.load %arg15[%c0_35, %c0_36] : memref<1x1xf32, #tpu.memory_space<vmem>>, vector<1x1xf32>
    tpu.vector_store %arg15[%c0_35, %c0_36], %68 {strides = array<i32>} : memref<1x1xf32, #tpu.memory_space<vmem>>, vector<1x1xf32>,
    %c0_37 = arith.constant 0 : index
    %c0_38 = arith.constant 0 : index
    %70 = vector.load %arg16[%c0_37, %c0_38] : memref<1x128xf32, #tpu.memory_space<vmem>>, vector<1x128xf32>
    %71 = vector.broadcast %60 : vector<1x1xf32> to vector<1x128xf32>
    %72 = arith.mulf %71, %70 : vector<1x128xf32>
    %73 = vector.broadcast %63 : vector<128x1xf32> to vector<128x128xf32>
    %74 = arith.mulf %73, %18 : vector<128x128xf32>
    %cst_39 = arith.constant dense<0.000000e+00> : vector<128xf32>
    %75 = vector.multi_reduction <add>, %74, %cst_39 [0] : vector<128x128xf32> to vector<128xf32>
    %76 = vector.shape_cast %75 : vector<128xf32> to vector<1x128xf32>
    %77 = arith.addf %72, %76 : vector<1x128xf32>
    %c0_40 = arith.constant 0 : index
    %c0_41 = arith.constant 0 : index
    %78 = vector.load %arg16[%c0_40, %c0_41] : memref<1x128xf32, #tpu.memory_space<vmem>>, vector<1x128xf32>
    tpu.vector_store %arg16[%c0_40, %c0_41], %77 {strides = array<i32>} : memref<1x128xf32, #tpu.memory_space<vmem>>, vector<1x128xf32>,
    %c0_42 = arith.constant 0 : index
    %c0_43 = arith.constant 0 : index
    %79 = vector.load %arg14[%c0_42, %c0_43] : memref<1x1xf32, #tpu.memory_space<vmem>>, vector<1x1xf32>
    tpu.vector_store %arg14[%c0_42, %c0_43], %57 {strides = array<i32>} : memref<1x1xf32, #tpu.memory_space<vmem>>, vector<1x1xf32>,
    %c2_i32 = arith.constant 2 : i32
    %80 = arith.cmpi eq, %arg0, %c2_i32 : i32
    %81 = arith.extui %80 : i1 to i32
    %c0_i32_44 = arith.constant 0 : i32
    %82 = arith.cmpi ne, %81, %c0_i32_44 : i32
    scf.if %82 {
      %c0_45 = arith.constant 0 : index
      %c0_46 = arith.constant 0 : index
      %83 = vector.load %arg15[%c0_45, %c0_46] : memref<1x1xf32, #tpu.memory_space<vmem>>, vector<1x1xf32>
      %84 = tpu.reciprocal %83 {approx = true} : vector<1x1xf32> -> vector<1x1xf32>
      %c0_47 = arith.constant 0 : index
      %c0_48 = arith.constant 0 : index
      %85 = vector.load %arg16[%c0_47, %c0_48] : memref<1x128xf32, #tpu.memory_space<vmem>>, vector<1x128xf32>
      %86 = vector.broadcast %84 : vector<1x1xf32> to vector<1x128xf32>
      %87 = arith.mulf %85, %86 : vector<1x128xf32>
      %c0_49 = arith.constant 0 : index
      %c0_50 = arith.constant 0 : index
      %88 = vector.load %arg10[%c0_49, %c0_50] : memref<128x4xf32, #tpu.memory_space<vmem>>, vector<128x4xf32>
      %cst_51 = arith.constant dense<0.000000e+00> : vector<1x4xf32>
      %89 = tpu.matmul %87, %88, %cst_51 {dimension_numbers = #tpu.dot_dimension_numbers<[1], [0], [0], [1], [0, 0, 1, 1], [], []>} : vector<1x128xf32>, vector<128x4xf32>, vector<1x4xf32> -> vector<1x4xf32>
      %c0_52 = arith.constant 0 : index
      %c0_53 = arith.constant 0 : index
      %90 = vector.load %arg11[%c0_52, %c0_53] : memref<1x4xf32, #tpu.memory_space<vmem>>, vector<1x4xf32>
      %91 = arith.addf %89, %90 : vector<1x4xf32>
      %c0_54 = arith.constant 0 : index
      %c0_55 = arith.constant 0 : index
      %92 = vector.load %arg12[%c0_54, %c0_55] : memref<1x4xf32, #tpu.memory_space<vmem>>, vector<1x4xf32>
      tpu.vector_store %arg12[%c0_54, %c0_55], %91 {strides = array<i32>} : memref<1x4xf32, #tpu.memory_space<vmem>>, vector<1x4xf32>,
      %c0_56 = arith.constant 0 : index
      %c0_57 = arith.constant 0 : index
      %93 = vector.load %arg13[%c0_56, %c0_57] : memref<384x1xf32, #tpu.memory_space<vmem>>, vector<384x1xf32>
      %c0_58 = arith.constant 0 : index
      %c0_59 = arith.constant 0 : index
      %94 = vector.load %arg14[%c0_58, %c0_59] : memref<1x1xf32, #tpu.memory_space<vmem>>, vector<1x1xf32>
      %95 = vector.broadcast %94 : vector<1x1xf32> to vector<384x1xf32>
      %96 = arith.subf %93, %95 : vector<384x1xf32>
      %97 = math.exp %96 : vector<384x1xf32>
      %98 = vector.broadcast %84 : vector<1x1xf32> to vector<384x1xf32>
      %99 = arith.mulf %97, %98 : vector<384x1xf32>
      %c0_60 = arith.constant 0 : index
      %c0_61 = arith.constant 0 : index
      %100 = vector.load %arg13[%c0_60, %c0_61] : memref<384x1xf32, #tpu.memory_space<vmem>>, vector<384x1xf32>
      tpu.vector_store %arg13[%c0_60, %c0_61], %99 {strides = array<i32>} : memref<384x1xf32, #tpu.memory_space<vmem>>, vector<384x1xf32>,
    } else {
    }
    return
  }
  func.func @transform_0(%arg0: i32) -> (i32, i32) {
    %c0_i32 = arith.constant 0 : i32
    %c0_i32_0 = arith.constant 0 : i32
    return %arg0, %c0_i32 : i32, i32
  }
  func.func @transform_1(%arg0: i32) -> (i32, i32) {
    %c0_i32 = arith.constant 0 : i32
    %c0_i32_0 = arith.constant 0 : i32
    %c0_i32_1 = arith.constant 0 : i32
    return %c0_i32, %c0_i32_0 : i32, i32
  }
  func.func @transform_2(%arg0: i32) -> (i32, i32) {
    %c0_i32 = arith.constant 0 : i32
    %c0_i32_0 = arith.constant 0 : i32
    %c0_i32_1 = arith.constant 0 : i32
    return %c0_i32, %c0_i32_0 : i32, i32
  }
  func.func @transform_3(%arg0: i32) -> (i32, i32) {
    %c0_i32 = arith.constant 0 : i32
    %c0_i32_0 = arith.constant 0 : i32
    %c0_i32_1 = arith.constant 0 : i32
    return %c0_i32, %c0_i32_0 : i32, i32
  }
  func.func @transform_4(%arg0: i32) -> (i32, i32) {
    %c0_i32 = arith.constant 0 : i32
    %c0_i32_0 = arith.constant 0 : i32
    %c0_i32_1 = arith.constant 0 : i32
    return %c0_i32, %c0_i32_0 : i32, i32
  }
  func.func @transform_5(%arg0: i32) -> (i32, i32) {
    %c0_i32 = arith.constant 0 : i32
    %c0_i32_0 = arith.constant 0 : i32
    %c0_i32_1 = arith.constant 0 : i32
    return %c0_i32, %c0_i32_0 : i32, i32
  }
  func.func @transform_6(%arg0: i32) -> (i32, i32) {
    %c0_i32 = arith.constant 0 : i32
    %c0_i32_0 = arith.constant 0 : i32
    %c0_i32_1 = arith.constant 0 : i32
    return %c0_i32, %c0_i32_0 : i32, i32
  }
  func.func @transform_7(%arg0: i32) -> (i32, i32) {
    %c0_i32 = arith.constant 0 : i32
    %c0_i32_0 = arith.constant 0 : i32
    %c0_i32_1 = arith.constant 0 : i32
    return %c0_i32, %c0_i32_0 : i32, i32
  }
  func.func @transform_8(%arg0: i32) -> (i32, i32) {
    %c0_i32 = arith.constant 0 : i32
    %c0_i32_0 = arith.constant 0 : i32
    %c0_i32_1 = arith.constant 0 : i32
    return %c0_i32, %c0_i32_0 : i32, i32
  }
  func.func @transform_9(%arg0: i32) -> (i32, i32) {
    %c0_i32 = arith.constant 0 : i32
    %c0_i32_0 = arith.constant 0 : i32
    %c0_i32_1 = arith.constant 0 : i32
    return %c0_i32, %c0_i32_0 : i32, i32
  }
  func.func @transform_10(%arg0: i32) -> (i32, i32) {
    %c0_i32 = arith.constant 0 : i32
    %c0_i32_0 = arith.constant 0 : i32
    %c0_i32_1 = arith.constant 0 : i32
    return %c0_i32, %c0_i32_0 : i32, i32
  }
  func.func @transform_11(%arg0: i32) -> (i32, i32) {
    %c0_i32 = arith.constant 0 : i32
    %c0_i32_0 = arith.constant 0 : i32
    %c0_i32_1 = arith.constant 0 : i32
    return %c0_i32, %c0_i32_0 : i32, i32
  }
  func.func @transform_12(%arg0: i32) -> (i32, i32) {
    %c0_i32 = arith.constant 0 : i32
    %c0_i32_0 = arith.constant 0 : i32
    %c0_i32_1 = arith.constant 0 : i32
    return %c0_i32, %c0_i32_0 : i32, i32
  }
}

</mosaic_0001>

<bundles_post_ra>
// kernel: tpu_custom_call.1
= control target key start
LH: loop header
LB: loop body
LE: loop exit
PB: predicated region body
PF: predicated region fallthrough
CT: control target
= control target key end

     0   :  { %s4044_s0 = inlined_call_operand.vmem [shape: bf16[384,32], index: 0, kind: input, shape index: {}]   ;;  %s4045_s1 = inlined_call_operand.vmem [shape: bf16[32,256], index: 1, kind: input, shape index: {}]   ;;  %s4046_s2 = inlined_call_operand.vmem [shape: f32[1,256], index: 2, kind: input, shape index: {}]   ;;  %s4047_s3 = inlined_call_operand.vmem [shape: bf16[256,128], index: 3, kind: input, shape index: {}]   ;;  %s4048_s4 = inlined_call_operand.vmem [shape: f32[1,128], index: 4, kind: input, shape index: {}]   ;;  %s4049_s5 = inlined_call_operand.vmem [shape: bf16[128,128], index: 5, kind: input, shape index: {}]   ;;  %s4050_s6 = inlined_call_operand.vmem [shape: f32[1,128], index: 6, kind: input, shape index: {}]   ;;  %s4051_s7 = inlined_call_operand.vmem [shape: f32[1,64], index: 7, kind: input, shape index: {}]   ;;  %s4052_s8 = inlined_call_operand.<no memory space> [shape: f32[1,1], index: 8, kind: input, shape index: {}]   ;;  %s4053_s9 = inlined_call_operand.vmem [shape: f32[128,4], index: 9, kind: input, shape index: {}]   ;;  %s4054_s10 = inlined_call_operand.vmem [shape: f32[1,4], index: 10, kind: input, shape index: {}]   ;;  %s4055_s11 = inlined_call_operand.hbm [shape: f32[1,4], index: 11, kind: output, shape index: {0}]   ;;  %s4056_s12 = inlined_call_operand.vmem [shape: f32[384,1], index: 12, kind: output, shape index: {1}]  }
   0x1   :  { %v18_v0 = vstv %s4052_s8 }
   0x2   :  { %19 = vst [vmem:[#allocation5] sm:$0x1] %v18_v0 }
   0x3   :  { %20 = vsyncpa [#allocation7], 0  ;;  %s2859_s23 = smov 0  }
   0x4 LB: > { %s2865_s24 = sadd.s32 4294967295, %s2781_s23   ;;  %p2217_p0 = scmp.ge.s32.totalorder %s2781_s23, 1  ;;  %s2781_s23 = sphi %s2859_s23, %s26_s23  }
   0x5   : > { %p359_p1 = scmp.lt.s32.totalorder %s2781_s23, 4 }
   0x7   : > { %p360_p2 = pnand %p2217_p0, %p359_p1 }
   0x8   : > { %s2218_s8 = sshll.u32 (!%p360_p2), %s2865_s24, 4  ;;  %p2220_p4 = scmp.ne.s32.totalorder (!%p360_p2), %s2865_s24, 0 }
   0x9   : > { %363 = sbr.rel (%p360_p2) target bundleno = 1584 (0x630), region = 64  ;;  %p397_p3 = scmp.lt.s32.totalorder (!%p360_p2), %s2218_s8, 47 }
   0xe   : > { %s4076_s8 = smov (!%p397_p3, %s2218_s8), 47  ;;  %406 = sbr.rel (%p2220_p4) target bundleno = 22 (0x16), region = 68 }
   0xf   : > { %s2219_s25 = sshll.u32 %s4076_s8, 2 }
  0x10   : > { %s2873_s28 = scalar_lea.vmem %s4044_s0, %s2219_s25 }
  0x13   : > { %vm407_vm0 = vcmask 0   ;;  %v2783_v1 = vmov -1e+30   ;;  %v2784_v2 = vmov 0.0  }
  0x14   : > { %408 = vst.msk [vmem:[#allocation2] sm:$0x1] %vm407_vm0, %v2783_v1  ;;  %409 = vst.msk [vmem:[#allocation3] sm:$0x1] %vm407_vm0, %v2784_v2 }
  0x15   : > { %410 = vst [vmem:[#allocation4] sm:$0x1] %v2784_v2 }
  0x16 PF: > { %v2480_v3 = vld [vmem:[%s4045_s1 + $0x14] ss:$8 sps:$4 sm:$0xff]   ;;  %v2482_v4 = vld [vmem:[%s4045_s1 + $0x10] ss:$8 sps:$4 sm:$0xff]   ;;  %v2785_v5 = vmov 0   ;;  %v2486_v8 = vld [vmem:[%s2873_s28] sm:$0xff]   ;;  %v433_v35 = vlaneseq }
  0x17   : > { %560 = vmatprep.mubr.bf16.mxu0 %v2785_v5  ;;  %2479 = vset.pattern.permute.xlu0 %v2785_v5  ;;  %v2483_v6 = vld [vmem:[%s4045_s1 + $0x4] ss:$8 sps:$4 sm:$0xff]   ;;  %v2485_v7 = vld [vmem:[%s4045_s1] ss:$8 sps:$4 sm:$0xff]   ;;  %vm503_vm1 = vcmask 261120   ;;  %v2494_v9 = vld [vmem:[%s4047_s3 + $0x78] sm:$0xff]  }
  0x18   : > { %540 = vmatprep.subr.bf16.mxu0 %v2480_v3  ;;  %2478 = vset.pattern.permute.xlu1 %v2785_v5  ;;  %v2487_v10 = vld [vmem:[%s2873_s28 + $0x8] sm:$0xff]   ;;  %v2495_v11 = vld [vmem:[%s4047_s3 + $0x38] sm:$0xff]   ;;  %v2496_v12 = vld [vmem:[%s4047_s3 + $0x70] sm:$0xff]   ;;  %v2961_v36 = vshrl.u32 %v433_v35, 7  ;;  %s2786_s8 = smov 64   ;;  %vm1328_vm2 = vcmask 523264  }
  0x19   : > { %541 = vmatpush1.bf16.msra.mxu0 %v2482_v4  ;;  %2292 = vmatprep.subr.bf16.mxu1 %v2494_v9  ;;  %v2497_v13 = vld [vmem:[%s4047_s3 + $0x30] sm:$0xff]   ;;  %v2498_v14 = vld [vmem:[%s4047_s3 + $0x68] sm:$0xff]   ;;  %v2500_v16 = vld [vmem:[%s4047_s3 + $0x60] sm:$0xff]   ;;  %s2285_s27 = sshll.u32 %s2865_s24, 7  ;;  %vm1468_vm4 = vcmask 7168   ;;  %p2286_p5 = scmp.ne.s32.totalorder %s2865_s24, 2 }
  0x1a   : > { %542 = vmatprep.subr.bf16.mxu0 %v2483_v6  ;;  %2293 = vmatpush3.bf16.msra.mxu1 %v2495_v11  ;;  %v2499_v15 = vld [vmem:[%s4047_s3 + $0x28] sm:$0xff]   ;;  %v2488_v17 = vld [vmem:[%s2873_s28 + $0x10] sm:$0xff]   ;;  %v2501_v18 = vld [vmem:[%s4047_s3 + $0x20] sm:$0xff]   ;;  %v439_v37 = vsub.s32 1, %v2961_v36  ;;  %v2965_v38 = vsub.s32 0, %v2961_v36  ;;  %s3275_s13 = scalar_lea.vmem %s4056_s12, %s2285_s27 }
  0x1b   : > { %2294 = vmatprep.subr.bf16.mxu1 %v2496_v12  ;;  %v2502_v19 = vld [vmem:[%s4047_s3 + $0x58] sm:$0xff]   ;;  %v2490_v22 = vld [vmem:[%s2873_s28 + $0x20] sm:$0xff]   ;;  %v2491_v23 = vld [vmem:[%s2873_s28 + $0x28] sm:$0xff]  }
  0x1c   : > { %v2503_v20 = vld [vmem:[%s4047_s3 + $0x18] sm:$0xff]   ;;  %v2492_v24 = vld [vmem:[%s2873_s28 + $0x30] sm:$0xff]   ;;  %v2506_v28 = vld [vmem:[%s4047_s3 + $0x48] sm:$0xff]  }
  0x1d   : > { %543 = vmatpush1.bf16.msra.mxu0 %v2485_v7  ;;  %v2489_v21 = vld [vmem:[%s2873_s28 + $0x18] sm:$0xff]   ;;  %v2504_v26 = vld [vmem:[%s4047_s3 + $0x50] sm:$0xff]   ;;  %v2507_v29 = vld [vmem:[%s4047_s3 + $0x8] sm:$0xff]  }
  0x1e   : > { %2295 = vmatpush3.bf16.msra.mxu1 %v2497_v13  ;;  %v2493_v25 = vld [vmem:[%s2873_s28 + $0x38] sm:$0xff]   ;;  %v2505_v27 = vld [vmem:[%s4047_s3 + $0x10] sm:$0xff]   ;;  %v2508_v30 = vld [vmem:[%s4047_s3 + $0x40] sm:$0xff]  }
  0x1f   : > { %2296 = vmatprep.subr.bf16.mxu1 %v2498_v14  ;;  %v2509_v31 = vld [vmem:[%s4047_s3] sm:$0xff]   ;;  %v2510_v32 = vld [vmem:[%s4049_s5 + $0x38] sm:$0xff]   ;;  %v2511_v33 = vld [vmem:[%s4049_s5 + $0x30] sm:$0xff]  }
  0x20   : > { %2233 = vmatmul.mubr.msk.bf16.vlgmr.msra.gmra.mxu0 %vm503_vm1, %v2486_v8  ;;  %2389 = vmatprep.subr.bf16.mxu0 %v2510_v32  ;;  %v2512_v34 = vld [vmem:[%s4049_s5 + $0x28] sm:$0xff]   ;;  %v431_v39 = vld [vmem:[%s4046_s2] sm:$0x3] }
  0x21   : > { %570 = vmatprep.mubr.bf16.mxu0 %v2785_v5  ;;  %2390 = vmatpush3.bf16.msra.mxu0 %v2510_v32  ;;  %v2970_v41 = vrot.slane %v431_v39, %v439_v37  ;;  %v2973_v42 = vrot.slane %v431_v39, %v2965_v38 }
  0x22   : > { %2297 = vmatpush3.bf16.msra.mxu1 %v2499_v15  ;;  %2391 = vmatprep.subr.bf16.mxu0 %v2511_v33 }
  0x23   : > { %2298 = vmatprep.subr.bf16.mxu1 %v2500_v16 }
  0x25   : > { %2392 = vmatpush3.bf16.msra.mxu0 %v2511_v33 }
  0x26   : > { %2299 = vmatpush3.bf16.msra.mxu1 %v2501_v18  ;;  %2393 = vmatprep.subr.bf16.mxu0 %v2512_v34 }
  0x27   : > { %2300 = vmatprep.subr.bf16.mxu1 %v2502_v19 }
  0x28   : > { %2234 = vmatmul.mubr.msk.bf16.gmra.mxu0 %vm503_vm1, %v2487_v10 }
  0x29   : > { %580 = vmatprep.mubr.bf16.mxu0 %v2785_v5  ;;  %2394 = vmatpush3.bf16.msra.mxu0 %v2512_v34 }
  0x2a   : > { %2301 = vmatpush3.bf16.msra.mxu1 %v2503_v20 }
  0x2b   : > { %2302 = vmatprep.subr.bf16.mxu1 %v2504_v26 }
  0x2e   : > { %2303 = vmatpush3.bf16.msra.mxu1 %v2505_v27 }
  0x2f   : > { %2304 = vmatprep.subr.bf16.mxu1 %v2506_v28 }
  0x30   : > { %2235 = vmatmul.mubr.msk.bf16.gmra.mxu0 %vm503_vm1, %v2488_v17 }
  0x31   : > { %590 = vmatprep.mubr.bf16.mxu0 %v2785_v5 }
  0x32   : > { %2305 = vmatpush3.bf16.msra.mxu1 %v2507_v29 }
  0x33   : > { %2306 = vmatprep.subr.bf16.mxu1 %v2508_v30 }
  0x36   : > { %2307 = vmatpush3.bf16.msra.mxu1 %v2509_v31 }
  0x38   : > { %2236 = vmatmul.mubr.msk.bf16.gmra.mxu0 %vm503_vm1, %v2489_v21 }
  0x39   : > { %600 = vmatprep.mubr.bf16.mxu0 %v2785_v5 }
  0x40   : > { %2237 = vmatmul.mubr.msk.bf16.gmra.mxu0 %vm503_vm1, %v2490_v22 }
  0x41   : > { %610 = vmatprep.mubr.bf16.mxu0 %v2785_v5 }
  0x48   : > { %2238 = vmatmul.mubr.msk.bf16.gmra.mxu0 %vm503_vm1, %v2491_v23 }
  0x49   : > { %620 = vmatprep.mubr.bf16.mxu0 %v2785_v5 }
  0x50   : > { %2239 = vmatmul.mubr.msk.bf16.gmra.mxu0 %vm503_vm1, %v2492_v24 }
  0x51   : > { %630 = vmatprep.mubr.bf16.mxu0 %v2785_v5 }
  0x58   : > { %2240 = vmatmul.mubr.msk.bf16.gmra.mxu0 %vm503_vm1, %v2493_v25 }
  0xe0   : > { %v562_v40 = vpop.f32.mrf.mxu0 }
  0xe1   : > { %v563_v47 = vadd.f32 %v562_v40, %v2973_v42 }
  0xe2   : > { %v564_v43 = vpop.f32.mrf.mxu0 }
  0xe3   : > { %v565_v45 = vadd.f32 %v564_v43, %v2970_v41  ;;  %v641_v54 = vmax.f32 %v563_v47, 0.0 }
  0xe4   : > { %v566_v44 = vpop.f32.mrf.mxu0 }
  0xe5   : > { %v567_v46 = vadd.f32 %v566_v44, %v2973_v42  ;;  %v642_v52 = vmax.f32 %v565_v45, 0.0 }
  0xe6   : > { %v568_v48 = vpop.f32.mrf.mxu0 }
  0xe7   : > { %v569_v49 = vadd.f32 %v568_v48, %v2970_v41  ;;  %v643_v50 = vmax.f32 %v567_v46, 0.0 }
  0xe8   : > { %v572_v51 = vpop.f32.mrf.mxu0 }
  0xe9   : > { %v644_v53 = vmax.f32 %v569_v49, 0.0  ;;  %v673_v57 = vpack.c.bf16 %v643_v50, %v641_v54  ;;  %v573_v61 = vadd.f32 %v572_v51, %v2973_v42 }
  0xea   : > { %v574_v55 = vpop.f32.mrf.mxu0 }
  0xeb   : > { %v674_v56 = vpack.c.bf16 %v644_v53, %v642_v52  ;;  %v575_v59 = vadd.f32 %v574_v55, %v2970_v41  ;;  %v645_v4 = vmax.f32 %v573_v61, 0.0 }
  0xec   : > { %v576_v58 = vpop.f32.mrf.mxu0 }
  0xed   : > { %v577_v60 = vadd.f32 %v576_v58, %v2973_v42  ;;  %856 = vmatprep.mubr.bf16.mxu1 %v674_v56  ;;  %v646_v2 = vmax.f32 %v575_v59, 0.0 }
  0xee   : > { %v578_v62 = vpop.f32.mrf.mxu0  ;;  %857 = vmatmul.mubr.bf16.vlgmr.msra.gmra.mxu1 %v673_v57 }
  0xef   : > { %v579_v63 = vadd.f32 %v578_v62, %v2970_v41  ;;  %v647_v0 = vmax.f32 %v577_v60, 0.0 }
  0xf0   : > { %v582_v1 = vpop.f32.mrf.mxu0 }
  0xf1   : > { %v648_v3 = vmax.f32 %v579_v63, 0.0  ;;  %v675_v7 = vpack.c.bf16 %v647_v0, %v645_v4  ;;  %v583_v11 = vadd.f32 %v582_v1, %v2973_v42 }
  0xf2   : > { %v584_v5 = vpop.f32.mrf.mxu0 }
  0xf3   : > { %v676_v6 = vpack.c.bf16 %v648_v3, %v646_v2  ;;  %v585_v9 = vadd.f32 %v584_v5, %v2970_v41  ;;  %v649_v18 = vmax.f32 %v583_v11, 0.0 }
  0xf4   : > { %v586_v8 = vpop.f32.mrf.mxu0 }
  0xf5   : > { %v587_v10 = vadd.f32 %v586_v8, %v2973_v42  ;;  %864 = vmatprep.mubr.bf16.mxu1 %v676_v6  ;;  %v650_v16 = vmax.f32 %v585_v9, 0.0 }
  0xf6   : > { %v588_v12 = vpop.f32.mrf.mxu0  ;;  %865 = vmatmul.mubr.bf16.gmra.mxu1 %v675_v7 }
  0xf7   : > { %v589_v13 = vadd.f32 %v588_v12, %v2970_v41  ;;  %v651_v14 = vmax.f32 %v587_v10, 0.0 }
  0xf8   : > { %v592_v15 = vpop.f32.mrf.mxu0 }
  0xf9   : > { %v652_v17 = vmax.f32 %v589_v13, 0.0  ;;  %v677_v21 = vpack.c.bf16 %v651_v14, %v649_v18  ;;  %v593_v25 = vadd.f32 %v592_v15, %v2973_v42 }
  0xfa   : > { %v594_v19 = vpop.f32.mrf.mxu0 }
  0xfb   : > { %v678_v20 = vpack.c.bf16 %v652_v17, %v650_v16  ;;  %v595_v23 = vadd.f32 %v594_v19, %v2970_v41  ;;  %v653_v32 = vmax.f32 %v593_v25, 0.0 }
  0xfc   : > { %v596_v22 = vpop.f32.mrf.mxu0 }
  0xfd   : > { %v597_v24 = vadd.f32 %v596_v22, %v2973_v42  ;;  %872 = vmatprep.mubr.bf16.mxu1 %v678_v20  ;;  %v654_v30 = vmax.f32 %v595_v23, 0.0 }
  0xfe   : > { %v598_v26 = vpop.f32.mrf.mxu0  ;;  %873 = vmatmul.mubr.bf16.gmra.mxu1 %v677_v21 }
  0xff   : > { %v599_v27 = vadd.f32 %v598_v26, %v2970_v41  ;;  %v655_v28 = vmax.f32 %v597_v24, 0.0 }
 0x100   : > { %v602_v29 = vpop.f32.mrf.mxu0 }
 0x101   : > { %v656_v31 = vmax.f32 %v599_v27, 0.0  ;;  %v679_v35 = vpack.c.bf16 %v655_v28, %v653_v32  ;;  %v603_v43 = vadd.f32 %v602_v29, %v2973_v42  ;;  %v2517_v32 = vld [vmem:[%s4049_s5] sm:$0xff]  }
 0x102   : > { %v604_v33 = vpop.f32.mrf.mxu0 }
 0x103   : > { %v680_v34 = vpack.c.bf16 %v656_v31, %v654_v30  ;;  %v605_v39 = vadd.f32 %v604_v33, %v2970_v41  ;;  %v657_v50 = vmax.f32 %v603_v43, 0.0  ;;  %v2513_v30 = vld [vmem:[%s4049_s5 + $0x20] sm:$0xff]   ;;  %v2516_v31 = vld [vmem:[%s4049_s5 + $0x8] sm:$0xff]  }
 0x104   : > { %v606_v37 = vpop.f32.mrf.mxu0  ;;  %2395 = vmatprep.subr.bf16.mxu0 %v2513_v30 }
 0x105   : > { %v607_v40 = vadd.f32 %v606_v37, %v2973_v42  ;;  %880 = vmatprep.mubr.bf16.mxu1 %v680_v34  ;;  %v658_v48 = vmax.f32 %v605_v39, 0.0  ;;  %2396 = vmatpush3.bf16.msra.mxu0 %v2513_v30  ;;  %v3025_v37 = vld [vmem:[%s4048_s4] ss:$0 sm:$0xff] }
 0x106   : > { %v608_v44 = vpop.f32.mrf.mxu0  ;;  %881 = vmatmul.mubr.bf16.gmra.mxu1 %v679_v35 }
 0x107   : > { %v609_v45 = vadd.f32 %v608_v44, %v2970_v41  ;;  %v659_v46 = vmax.f32 %v607_v40, 0.0 }
 0x108   : > { %v612_v47 = vpop.f32.mrf.mxu0 }
 0x109   : > { %v660_v49 = vmax.f32 %v609_v45, 0.0  ;;  %v681_v53 = vpack.c.bf16 %v659_v46, %v657_v50  ;;  %v613_v57 = vadd.f32 %v612_v47, %v2973_v42 }
 0x10a   : > { %v614_v51 = vpop.f32.mrf.mxu0 }
 0x10b   : > { %v682_v52 = vpack.c.bf16 %v660_v49, %v658_v48  ;;  %v615_v55 = vadd.f32 %v614_v51, %v2970_v41  ;;  %v661_v0 = vmax.f32 %v613_v57, 0.0 }
 0x10c   : > { %v616_v54 = vpop.f32.mrf.mxu0 }
 0x10d   : > { %v617_v56 = vadd.f32 %v616_v54, %v2973_v42  ;;  %888 = vmatprep.mubr.bf16.mxu1 %v682_v52  ;;  %v662_v62 = vmax.f32 %v615_v55, 0.0 }
 0x10e   : > { %v618_v58 = vpop.f32.mrf.mxu0  ;;  %889 = vmatmul.mubr.bf16.gmra.mxu1 %v681_v53 }
 0x10f   : > { %v619_v59 = vadd.f32 %v618_v58, %v2970_v41  ;;  %v663_v60 = vmax.f32 %v617_v56, 0.0 }
 0x110   : > { %v622_v61 = vpop.f32.mrf.mxu0 }
 0x111   : > { %v664_v63 = vmax.f32 %v619_v59, 0.0  ;;  %v683_v3 = vpack.c.bf16 %v663_v60, %v661_v0  ;;  %v623_v7 = vadd.f32 %v622_v61, %v2973_v42 }
 0x112   : > { %v624_v1 = vpop.f32.mrf.mxu0 }
 0x113   : > { %v684_v2 = vpack.c.bf16 %v664_v63, %v662_v62  ;;  %v625_v5 = vadd.f32 %v624_v1, %v2970_v41  ;;  %v665_v14 = vmax.f32 %v623_v7, 0.0 }
 0x114   : > { %v626_v4 = vpop.f32.mrf.mxu0 }
 0x115   : > { %v627_v6 = vadd.f32 %v626_v4, %v2973_v42  ;;  %896 = vmatprep.mubr.bf16.mxu1 %v684_v2  ;;  %v666_v12 = vmax.f32 %v625_v5, 0.0 }
 0x116   : > { %v628_v8 = vpop.f32.mrf.mxu0  ;;  %897 = vmatmul.mubr.bf16.gmra.mxu1 %v683_v3 }
 0x117   : > { %v629_v9 = vadd.f32 %v628_v8, %v2970_v41  ;;  %v667_v10 = vmax.f32 %v627_v6, 0.0 }
 0x118   : > { %v632_v11 = vpop.f32.mrf.mxu0 }
 0x119   : > { %v668_v13 = vmax.f32 %v629_v9, 0.0  ;;  %v685_v17 = vpack.c.bf16 %v667_v10, %v665_v14  ;;  %v633_v21 = vadd.f32 %v632_v11, %v2973_v42 }
 0x11a   : > { %v634_v15 = vpop.f32.mrf.mxu0 }
 0x11b   : > { %v686_v16 = vpack.c.bf16 %v668_v13, %v666_v12  ;;  %v635_v19 = vadd.f32 %v634_v15, %v2970_v41  ;;  %v669_v27 = vmax.f32 %v633_v21, 0.0 }
 0x11c   : > { %v636_v18 = vpop.f32.mrf.mxu0 }
 0x11d   : > { %v637_v20 = vadd.f32 %v636_v18, %v2973_v42  ;;  %904 = vmatprep.mubr.bf16.mxu1 %v686_v16  ;;  %v670_v25 = vmax.f32 %v635_v19, 0.0  ;;  %v2514_v42 = vld [vmem:[%s4049_s5 + $0x18] sm:$0xff]  }
 0x11e   : > { %v638_v22 = vpop.f32.mrf.mxu0  ;;  %905 = vmatmul.mubr.bf16.gmra.mxu1 %v685_v17  ;;  %2397 = vmatprep.subr.bf16.mxu0 %v2514_v42 }
 0x11f   : > { %v639_v23 = vadd.f32 %v638_v22, %v2970_v41  ;;  %v671_v24 = vmax.f32 %v637_v20, 0.0  ;;  %2398 = vmatpush3.bf16.msra.mxu0 %v2514_v42  ;;  %v2515_v41 = vld [vmem:[%s4049_s5 + $0x10] sm:$0xff]  }
 0x120   : > { %2399 = vmatprep.subr.bf16.mxu0 %v2515_v41 }
 0x121   : > { %v672_v26 = vmax.f32 %v639_v23, 0.0  ;;  %v687_v29 = vpack.c.bf16 %v671_v24, %v669_v27 }
 0x123   : > { %v688_v28 = vpack.c.bf16 %v672_v26, %v670_v25  ;;  %2400 = vmatpush3.bf16.msra.mxu0 %v2515_v41 }
 0x124   : > { %2401 = vmatprep.subr.bf16.mxu0 %v2516_v31 }
 0x125   : > { %912 = vmatprep.mubr.bf16.mxu1 %v688_v28 }
 0x126   : > { %913 = vmatmul.mubr.bf16.gmra.mxu1 %v687_v29 }
 0x127   : > { %2402 = vmatpush3.bf16.msra.mxu0 %v2516_v31 }
 0x128   : > { %2403 = vmatprep.subr.bf16.mxu0 %v2517_v32 }
 0x12b   : > { %2404 = vmatpush3.bf16.msra.mxu0 %v2517_v32 }
 0x1ae   : > { %v2308_v33 = vpop.f32.mrf.mxu1 }
 0x1b0   : > { %v2309_v34 = vpop.f32.mrf.mxu1 }
 0x1b1   : > { %v2310_v35 = vadd.f32 %v2309_v34, %v2308_v33 }
 0x1b2   : > { %v2311_v39 = vpop.f32.mrf.mxu1 }
 0x1b3   : > { %v3028_v43 = vadd.f32 %v2310_v35, %v3025_v37 }
 0x1b4   : > { %v2312_v40 = vpop.f32.mrf.mxu1 }
 0x1b5   : > { %v2313_v44 = vadd.f32 %v2312_v40, %v2311_v39  ;;  %v921_v48 = vmax.f32 %v3028_v43, 0.0 }
 0x1b6   : > { %v2314_v45 = vpop.f32.mrf.mxu1 }
 0x1b7   : > { %v3031_v46 = vadd.f32 %v2313_v44, %v3025_v37 }
 0x1b8   : > { %v2315_v47 = vpop.f32.mrf.mxu1 }
 0x1b9   : > { %v922_v49 = vmax.f32 %v3031_v46, 0.0  ;;  %v2316_v50 = vadd.f32 %v2315_v47, %v2314_v45 }
 0x1ba   : > { %v2317_v51 = vpop.f32.mrf.mxu1 }
 0x1bb   : > { %v937_v52 = vpack.c.bf16 %v922_v49, %v921_v48  ;;  %v3040_v54 = vadd.f32 %v2316_v50, %v3025_v37 }
 0x1bc   : > { %v2318_v53 = vpop.f32.mrf.mxu1 }
 0x1bd   : > { %v2319_v55 = vadd.f32 %v2318_v53, %v2317_v51  ;;  %2405 = vmatprep.mubr.bf16.mxu0 %v937_v52  ;;  %v923_v59 = vmax.f32 %v3040_v54, 0.0 }
 0x1be   : > { %v2320_v56 = vpop.f32.mrf.mxu1 }
 0x1bf   : > { %v3043_v57 = vadd.f32 %v2319_v55, %v3025_v37 }
 0x1c0   : > { %v2321_v58 = vpop.f32.mrf.mxu1 }
 0x1c1   : > { %v924_v60 = vmax.f32 %v3043_v57, 0.0  ;;  %v2322_v61 = vadd.f32 %v2321_v58, %v2320_v56 }
 0x1c2   : > { %v2323_v62 = vpop.f32.mrf.mxu1 }
 0x1c3   : > { %v938_v63 = vpack.c.bf16 %v924_v60, %v923_v59  ;;  %v3052_v1 = vadd.f32 %v2322_v61, %v3025_v37 }
 0x1c4   : > { %v2324_v0 = vpop.f32.mrf.mxu1 }
 0x1c5   : > { %v2325_v2 = vadd.f32 %v2324_v0, %v2323_v62  ;;  %2406 = vmatmul.mubr.bf16.vlgmr.msra.gmra.mxu0 %v938_v63  ;;  %v925_v6 = vmax.f32 %v3052_v1, 0.0 }
 0x1c6   : > { %v2326_v3 = vpop.f32.mrf.mxu1 }
 0x1c7   : > { %v3055_v4 = vadd.f32 %v2325_v2, %v3025_v37 }
 0x1c8   : > { %v2327_v5 = vpop.f32.mrf.mxu1 }
 0x1c9   : > { %v926_v7 = vmax.f32 %v3055_v4, 0.0  ;;  %v2328_v8 = vadd.f32 %v2327_v5, %v2326_v3 }
 0x1ca   : > { %v2329_v9 = vpop.f32.mrf.mxu1 }
 0x1cb   : > { %v939_v10 = vpack.c.bf16 %v926_v7, %v925_v6  ;;  %v3064_v12 = vadd.f32 %v2328_v8, %v3025_v37 }
 0x1cc   : > { %v2330_v11 = vpop.f32.mrf.mxu1 }
 0x1cd   : > { %v2331_v13 = vadd.f32 %v2330_v11, %v2329_v9  ;;  %2409 = vmatprep.mubr.bf16.mxu0 %v939_v10  ;;  %v927_v17 = vmax.f32 %v3064_v12, 0.0 }
 0x1ce   : > { %v2332_v14 = vpop.f32.mrf.mxu1 }
 0x1cf   : > { %v3067_v15 = vadd.f32 %v2331_v13, %v3025_v37 }
 0x1d0   : > { %v2333_v16 = vpop.f32.mrf.mxu1 }
 0x1d1   : > { %v4065_v18 = vmax.f32 %v3067_v15, 0.0  ;;  %v2334_v19 = vadd.f32 %v2333_v16, %v2332_v14  ;;  %v3126_v14 = vld [vmem:[%s4050_s6] ss:$0 sm:$0xff] }
 0x1d2   : > { %v2335_v20 = vpop.f32.mrf.mxu1 }
 0x1d3   : > { %v940_v21 = vpack.c.bf16 %v4065_v18, %v927_v17  ;;  %v3076_v23 = vadd.f32 %v2334_v19, %v3025_v37 }
 0x1d4   : > { %v2336_v22 = vpop.f32.mrf.mxu1 }
 0x1d5   : > { %v2337_v24 = vadd.f32 %v2336_v22, %v2335_v20  ;;  %2410 = vmatmul.mubr.bf16.gmra.mxu0 %v940_v21  ;;  %v4064_v28 = vmax.f32 %v3076_v23, 0.0 }
 0x1d6   : > { %v2338_v25 = vpop.f32.mrf.mxu1 }
 0x1d7   : > { %v3079_v26 = vadd.f32 %v2337_v24, %v3025_v37 }
 0x1d8   : > { %v2339_v27 = vpop.f32.mrf.mxu1 }
 0x1d9   : > { %v4063_v29 = vmax.f32 %v3079_v26, 0.0  ;;  %v2340_v30 = vadd.f32 %v2339_v27, %v2338_v25  ;;  %v4068_v4 = vmax.f32 %v3079_v26, 0.0 }
 0x1da   : > { %v2341_v42 = vpop.f32.mrf.mxu1 }
 0x1db   : > { %v941_v41 = vpack.c.bf16 %v4063_v29, %v4064_v28  ;;  %v3088_v32 = vadd.f32 %v2340_v30, %v3025_v37 }
 0x1dc   : > { %v2342_v31 = vpop.f32.mrf.mxu1 }
 0x1dd   : > { %v2343_v33 = vadd.f32 %v2342_v31, %v2341_v42  ;;  %2413 = vmatprep.mubr.bf16.mxu0 %v941_v41  ;;  %v4062_v40 = vmax.f32 %v3088_v32, 0.0  ;;  %v4069_v12 = vmax.f32 %v3088_v32, 0.0 }
 0x1de   : > { %v2344_v34 = vpop.f32.mrf.mxu1 }
 0x1df   : > { %v3091_v35 = vadd.f32 %v2343_v33, %v3025_v37 }
 0x1e0   : > { %v2345_v39 = vpop.f32.mrf.mxu1 }
 0x1e1   : > { %v4061_v44 = vmax.f32 %v3091_v35, 0.0  ;;  %v2346_v45 = vadd.f32 %v2345_v39, %v2344_v34 }
 0x1e2   : > { %v2347_v47 = vpop.f32.mrf.mxu1 }
 0x1e3   : > { %v942_v50 = vpack.c.bf16 %v4061_v44, %v4062_v40  ;;  %v3100_v52 = vadd.f32 %v2346_v45, %v3025_v37 }
 0x1e4   : > { %v2348_v51 = vpop.f32.mrf.mxu1 }
 0x1e5   : > { %v2349_v53 = vadd.f32 %v2348_v51, %v2347_v47  ;;  %2414 = vmatmul.mubr.bf16.gmra.mxu0 %v942_v50  ;;  %v4060_v61 = vmax.f32 %v3100_v52, 0.0 }
 0x1e6   : > { %v2350_v55 = vpop.f32.mrf.mxu1 }
 0x1e7   : > { %v3103_v56 = vadd.f32 %v2349_v53, %v3025_v37 }
 0x1e8   : > { %v2351_v58 = vpop.f32.mrf.mxu1 }
 0x1e9   : > { %v4059_v62 = vmax.f32 %v3103_v56, 0.0  ;;  %v2352_v63 = vadd.f32 %v2351_v58, %v2350_v55  ;;  %v4072_v26 = vmax.f32 %v3103_v56, 0.0 }
 0x1ea   : > { %v2353_v0 = vpop.f32.mrf.mxu1 }
 0x1eb   : > { %v943_v2 = vpack.c.bf16 %v4059_v62, %v4060_v61  ;;  %v3112_v5 = vadd.f32 %v2352_v63, %v3025_v37 }
 0x1ec   : > { %v2354_v3 = vpop.f32.mrf.mxu1 }
 0x1ed   : > { %v2355_v8 = vadd.f32 %v2354_v3, %v2353_v0  ;;  %2417 = vmatprep.mubr.bf16.mxu0 %v943_v2  ;;  %v4058_v10 = vmax.f32 %v3112_v5, 0.0 }
 0x1ef   : > { %v3115_v9 = vadd.f32 %v2355_v8, %v3025_v37 }
 0x1f1   : > { %v4057_v11 = vmax.f32 %v3115_v9, 0.0 }
 0x1f3   : > { %v944_v13 = vpack.c.bf16 %v4057_v11, %v4058_v10 }
 0x1f5   : > { %2418 = vmatmul.mubr.bf16.gmra.mxu0 %v944_v13 }
 0x285   : > { %v2407_v16 = vpop.f32.mrf.mxu0 }
 0x286   : > { %v3129_v19 = vadd.f32 %v2407_v16, %v3126_v14 }
 0x287   : > { %v1050_v37 = vpop.f32.mrf.mxu0 }
 0x288   : > { %v2269_v20 = vmul.f32 -1.442695, %v3129_v19  ;;  %v3133_v21 = vadd.f32 %v3126_v14, %v1050_v37 }
 0x289   : > { %v2408_v22 = vpop.f32.mrf.mxu0 }
 0x28a   : > { %2518 = vpow2.f32 %v2269_v20  ;;  %v2267_v24 = vmul.f32 -1.442695, %v3133_v21  ;;  %v3137_v25 = vadd.f32 %v2408_v22, %v3126_v14 }
 0x28b   : > { %v1053_v27 = vpop.f32.mrf.mxu0 }
 0x28c   : > { %2520 = vpow2.f32 %v2267_v24  ;;  %v2270_v30 = vmul.f32 -1.442695, %v3137_v25  ;;  %v3141_v42 = vadd.f32 %v3126_v14, %v1053_v27 }
 0x28e   : > { %2522 = vpow2.f32 %v2270_v30  ;;  %v2268_v41 = vmul.f32 -1.442695, %v3141_v42 }
 0x290   : > { %2524 = vpow2.f32 %v2268_v41 }
 0x295   : > { %v2411_v31 = vpop.f32.mrf.mxu0 }
 0x296   : > { %v3145_v33 = vadd.f32 %v2411_v31, %v3126_v14 }
 0x297   : > { %v2519_v34 = vpop.eup %2518  ;;  %v1066_v39 = vpop.f32.mrf.mxu0 }
 0x298   : > { %v1179_v45 = vadd.f32 1.0, %v2519_v34  ;;  %v2273_v47 = vmul.f32 -1.442695, %v3145_v33  ;;  %v3149_v50 = vadd.f32 %v3126_v14, %v1066_v39 }
 0x299   : > { %v2521_v51 = vpop.eup %2520  ;;  %v2412_v53 = vpop.f32.mrf.mxu0 }
 0x29a   : > { %2526 = vrcp.f32 %v1179_v45  ;;  %v1177_v55 = vadd.f32 1.0, %v2521_v51  ;;  %v3152_v58 = vadd.f32 %v2412_v53, %v3126_v14  ;;  %v2271_v0 = vmul.f32 -1.442695, %v3149_v50 }
 0x29b   : > { %v2523_v63 = vpop.eup %2522  ;;  %2528 = vpow2.f32 %v2273_v47  ;;  %v1069_v2 = vpop.f32.mrf.mxu0 }
 0x29c   : > { %2530 = vrcp.f32 %v1177_v55  ;;  %v1180_v3 = vadd.f32 1.0, %v2523_v63  ;;  %v3156_v8 = vadd.f32 %v3126_v14, %v1069_v2  ;;  %v2274_v37 = vmul.f32 -1.442695, %v3152_v58 }
 0x29d   : > { %v2525_v13 = vpop.eup %2524 }
 0x29e   : > { %2532 = vrcp.f32 %v1180_v3  ;;  %v1178_v16 = vadd.f32 1.0, %v2525_v13  ;;  %v2272_v20 = vmul.f32 -1.442695, %v3156_v8 }
 0x29f   : > { %2534 = vpow2.f32 %v2271_v0 }
 0x2a0   : > { %2536 = vrcp.f32 %v1178_v16 }
 0x2a1   : > { %2538 = vpow2.f32 %v2274_v37 }
 0x2a2   : > { %2540 = vpow2.f32 %v2272_v20 }
 0x2a5   : > { %v2415_v22 = vpop.f32.mrf.mxu0 }
 0x2a6   : > { %v3161_v24 = vadd.f32 %v2415_v22, %v3126_v14 }
 0x2a7   : > { %v2527_v27 = vpop.eup %2526  ;;  %v1082_v30 = vpop.f32.mrf.mxu0 }
 0x2a8   : > { %v2529_v41 = vpop.eup %2528  ;;  %v2277_v31 = vmul.f32 -1.442695, %v3161_v24  ;;  %v3165_v34 = vadd.f32 %v3126_v14, %v1082_v30  ;;  %1245 = vrot.lane.b32.xlu1 %v2527_v27, %s2786_s8 }
 0x2a9   : > { %v2531_v39 = vpop.eup %2530  ;;  %v1183_v45 = vadd.f32 1.0, %v2529_v41  ;;  %v2416_v47 = vpop.f32.mrf.mxu0 }
 0x2aa   : > { %2542 = vpow2.f32 %v2277_v31  ;;  %v2275_v51 = vmul.f32 -1.442695, %v3165_v34  ;;  %v3170_v53 = vadd.f32 %v2416_v47, %v3126_v14  ;;  %1241 = vrot.lane.b32.xlu0 %v2531_v39, %s2786_s8 }
 0x2ab   : > { %v2533_v55 = vpop.eup %2532  ;;  %2544 = vrcp.f32 %v1183_v45  ;;  %v1085_v63 = vpop.f32.mrf.mxu0 }
 0x2ac   : > { %v2535_v0 = vpop.eup %2534  ;;  %v2278_v2 = vmul.f32 -1.442695, %v3170_v53  ;;  %v3175_v3 = vadd.f32 %v3126_v14, %v1085_v63  ;;  %1247 = vrot.lane.b32.xlu1 %v2533_v55, %s2786_s8  ;;  %2546 = vpow2.f32 %v2275_v51 }
 0x2ad   : > { %v2537_v13 = vpop.eup %2536  ;;  %v1181_v16 = vadd.f32 1.0, %v2535_v0 }
 0x2ae   : > { %1243 = vrot.lane.b32.xlu0 %v2537_v13, %s2786_s8  ;;  %v2539_v37 = vpop.eup %2538  ;;  %v2276_v20 = vmul.f32 -1.442695, %v3175_v3 }
 0x2af   : > { %2548 = vrcp.f32 %v1181_v16  ;;  %v1184_v22 = vadd.f32 1.0, %v2539_v37  ;;  %v2541_v27 = vpop.eup %2540 }
 0x2b0   : > { %2550 = vpow2.f32 %v2278_v2  ;;  %v1182_v30 = vadd.f32 1.0, %v2541_v27 }
 0x2b1   : > { %2552 = vrcp.f32 %v1184_v22 }
 0x2b2   : > { %2554 = vpow2.f32 %v2276_v20 }
 0x2b3   : > { %2556 = vrcp.f32 %v1182_v30 }
 0x2b5   : > { %v2419_v41 = vpop.f32.mrf.mxu0 }
 0x2b6   : > { %v3181_v31 = vadd.f32 %v2419_v41, %v3126_v14 }
 0x2b7   : > { %v2543_v39 = vpop.eup %2542  ;;  %v1098_v45 = vpop.f32.mrf.mxu0 }
 0x2b8   : > { %v2545_v47 = vpop.eup %2544  ;;  %v1187_v51 = vadd.f32 1.0, %v2543_v39  ;;  %v2281_v55 = vmul.f32 -1.442695, %v3181_v31  ;;  %v3185_v63 = vadd.f32 %v3126_v14, %v1098_v45 }
 0x2b9   : > { %1253 = vrot.lane.b32.xlu0 %v2545_v47, %s2786_s8  ;;  %v2420_v0 = vpop.f32.mrf.mxu0  ;;  %v2547_v2 = vpop.eup %2546 }
 0x2ba   : > { %2558 = vrcp.f32 %v1187_v51  ;;  %v2279_v13 = vmul.f32 -1.442695, %v3185_v63  ;;  %v3190_v16 = vadd.f32 %v2420_v0, %v3126_v14  ;;  %v1185_v37 = vadd.f32 1.0, %v2547_v2 }
 0x2bb   : > { %v1101_v20 = vpop.f32.mrf.mxu0  ;;  %2560 = vpow2.f32 %v2281_v55 }
 0x2bc   : > { %v2549_v22 = vpop.eup %2548  ;;  %v3193_v27 = vadd.f32 %v3126_v14, %v1101_v20  ;;  %2562 = vrcp.f32 %v1185_v37  ;;  %v2282_v39 = vmul.f32 -1.442695, %v3190_v16 }
 0x2bd   : > { %v2551_v30 = vpop.eup %2550  ;;  %1249 = vrot.lane.b32.xlu0 %v2549_v22, %s2786_s8  ;;  %2564 = vpow2.f32 %v2279_v13 }
 0x2be   : > { %v1188_v41 = vadd.f32 1.0, %v2551_v30  ;;  %v2553_v45 = vpop.eup %2552  ;;  %v2280_v51 = vmul.f32 -1.442695, %v3193_v27 }
 0x2bf   : > { %v2555_v47 = vpop.eup %2554  ;;  %1255 = vrot.lane.b32.xlu1 %v2553_v45, %s2786_s8 }
 0x2c0   : > { %2566 = vrcp.f32 %v1188_v41  ;;  %v1186_v0 = vadd.f32 1.0, %v2555_v47  ;;  %v2557_v55 = vpop.eup %2556 }
 0x2c1   : > { %2568 = vpow2.f32 %v2282_v39 }
 0x2c2   : > { %2570 = vrcp.f32 %v1186_v0 }
 0x2c3   : > { %2572 = vpow2.f32 %v2280_v51  ;;  %1251 = vrot.lane.b32.xlu1 %v2557_v55, %s2786_s8 }
 0x2c7   : > { %v2559_v14 = vpop.eup %2558 }
 0x2c8   : > { %1261 = vrot.lane.b32.xlu0 %v2559_v14, %s2786_s8  ;;  %v2561_v2 = vpop.eup %2560 }
 0x2c9   : > { %v2563_v13 = vpop.eup %2562  ;;  %v1191_v30 = vadd.f32 1.0, %v2561_v2 }
 0x2ca   : > { %v2565_v37 = vpop.eup %2564 }
 0x2cb   : > { %v1189_v20 = vadd.f32 1.0, %v2565_v37 }
 0x2cc   : > { %1257 = vrot.lane.b32.xlu0 %v2563_v13, %s2786_s8 }
 0x2cd   : > { %v2567_v22 = vpop.eup %2566  ;;  %2574 = vrcp.f32 %v1189_v20  ;;  %v3215_v20 = vld [vmem:[%s4051_s7] ss:$0 sm:$0xff] }
 0x2ce   : > { %1263 = vrot.lane.b32.xlu1 %v2567_v22, %s2786_s8  ;;  %v2569_v41 = vpop.eup %2568  ;;  %2576 = vrcp.f32 %v1191_v30 }
 0x2cf   : > { %v2571_v39 = vpop.eup %2570  ;;  %v1192_v51 = vadd.f32 1.0, %v2569_v41 }
 0x2d0   : > { %v2573_v45 = vpop.eup %2572 }
 0x2d1   : > { %v1190_v47 = vadd.f32 1.0, %v2573_v45 }
 0x2d2   : > { %1259 = vrot.lane.b32.xlu1 %v2571_v39, %s2786_s8 }
 0x2d3   : > { %2578 = vrcp.f32 %v1190_v47 }
 0x2d4   : > { %2580 = vrcp.f32 %v1192_v51 }
 0x2d5   : > { %2582 = vtanh.f32 %v3129_v19 }
 0x2d6   : > { %2584 = vtanh.f32 %v3133_v21 }
 0x2d7   : > { %2586 = vtanh.f32 %v3137_v25 }
 0x2d8   : > { %2588 = vtanh.f32 %v3141_v42 }
 0x2d9   : > { %2590 = vtanh.f32 %v3145_v33 }
 0x2da   : > { %v2575_v0 = vpop.eup %2574  ;;  %2592 = vtanh.f32 %v3149_v50 }
 0x2db   : > { %1265 = vrot.lane.b32.xlu0 %v2575_v0, %s2786_s8  ;;  %v2577_v55 = vpop.eup %2576  ;;  %2594 = vtanh.f32 %v3152_v58 }
 0x2dc   : > { %2596 = vtanh.f32 %v3156_v8 }
 0x2dd   : > { %2598 = vtanh.f32 %v3161_v24 }
 0x2de   : > { %2600 = vtanh.f32 %v3165_v34 }
 0x2df   : > { %1269 = vrot.lane.b32.xlu0 %v2577_v55, %s2786_s8  ;;  %2602 = vtanh.f32 %v3170_v53 }
 0x2e0   : > { %v2579_v14 = vpop.eup %2578  ;;  %2604 = vtanh.f32 %v3175_v3 }
 0x2e1   : > { %1267 = vrot.lane.b32.xlu1 %v2579_v14, %s2786_s8  ;;  %v2581_v2 = vpop.eup %2580  ;;  %2606 = vtanh.f32 %v3185_v63 }
 0x2e2   : > { %v2583_v13 = vpop.eup %2582  ;;  %2608 = vtanh.f32 %v3181_v31 }
 0x2e3   : > { %v2585_v30 = vpop.eup %2584  ;;  %2610 = vtanh.f32 %v3193_v27 }
 0x2e4   : > { %v2587_v45 = vpop.eup %2586  ;;  %2612 = vtanh.f32 %v3190_v16 }
 0x2e5   : > { %1271 = vrot.lane.b32.xlu1 %v2581_v2, %s2786_s8  ;;  %v2589_v51 = vpop.eup %2588 }
 0x31a   : > { %v1246_v37 = vpop.permute.xlu1 %1245 }
 0x31b   : > { %v1291_v22 = vmul.f32 %v2583_v13, %v1246_v37 }
 0x31c   : > { %v1242_v41 = vpop.permute.xlu0 %1241 }
 0x31d   : > { %v1289_v39 = vmul.f32 %v2585_v30, %v1242_v41  ;;  %v1314_v19 = vmul.f32 %v3215_v20, %v1291_v22  ;;  %v2591_v22 = vpop.eup %2590 }
 0x31e   : > { %v1248_v21 = vpop.permute.xlu1 %1247 }
 0x31f   : > { %v1292_v25 = vmul.f32 %v2587_v45, %v1248_v21  ;;  %v1335_v42 = vsel %vm1328_vm2, %v1314_v19, 0.0  ;;  %v1312_v47 = vmul.f32 %v3215_v20, %v1289_v39  ;;  %v2593_v39 = vpop.eup %2592 }
 0x320   : > { %1336 = vadd.xlane.f32.xlu0 %v1335_v42  ;;  %v1244_v0 = vpop.permute.xlu0 %1243  ;;  %v2595_v21 = vpop.eup %2594 }
 0x321   : > { %v1290_v55 = vmul.f32 %v2589_v51, %v1244_v0  ;;  %v1329_v14 = vsel %vm1328_vm2, %v1312_v47, 0.0  ;;  %v1315_v13 = vmul.f32 %v3215_v20, %v1292_v25  ;;  %v2597_v51 = vpop.eup %2596 }
 0x323   : > { %v1313_v2 = vmul.f32 %v3215_v20, %v1290_v55  ;;  %v1338_v37 = vsel %vm1328_vm2, %v1315_v13, 0.0 }
 0x324   : > { %1330 = vadd.xlane.f32.xlu0 %v1329_v14 }
 0x325   : > { %v1332_v33 = vsel %vm1328_vm2, %v1313_v2, 0.0  ;;  %v2599_v2 = vpop.eup %2598 }
 0x326   : > { %1333 = vadd.xlane.f32.xlu1 %v1332_v33 }
 0x328   : > { %1339 = vadd.xlane.f32.xlu0 %v1338_v37 }
 0x32b   : > { %v1254_v30 = vpop.permute.xlu0 %1253 }
 0x32c   : > { %v1295_v50 = vmul.f32 %v2591_v22, %v1254_v30  ;;  %v2601_v22 = vpop.eup %2600 }
 0x32d   : > { %v2603_v3 = vpop.eup %2602 }
 0x32e   : > { %v1318_v41 = vmul.f32 %v3215_v20, %v1295_v50 }
 0x32f   : > { %v1250_v19 = vpop.permute.xlu0 %1249 }
 0x330   : > { %v1293_v45 = vmul.f32 %v2593_v39, %v1250_v19  ;;  %v1347_v58 = vsel %vm1328_vm2, %v1318_v41, 0.0 }
 0x331   : > { %1348 = vadd.xlane.f32.xlu1 %v1347_v58  ;;  %v1256_v25 = vpop.permute.xlu1 %1255 }
 0x332   : > { %v1316_v42 = vmul.f32 %v3215_v20, %v1293_v45  ;;  %v1296_v8 = vmul.f32 %v2595_v21, %v1256_v25  ;;  %v2605_v25 = vpop.eup %2604 }
 0x334   : > { %v1341_v47 = vsel %vm1328_vm2, %v1316_v42, 0.0  ;;  %v1319_v24 = vmul.f32 %v3215_v20, %v1296_v8 }
 0x335   : > { %1342 = vadd.xlane.f32.xlu1 %v1341_v47  ;;  %v1252_v0 = vpop.permute.xlu1 %1251 }
 0x336   : > { %v1294_v55 = vmul.f32 %v2597_v51, %v1252_v0  ;;  %v1350_v34 = vsel %vm1328_vm2, %v1319_v24, 0.0  ;;  %v2607_v51 = vpop.eup %2606 }
 0x337   : > { %1351 = vadd.xlane.f32.xlu0 %v1350_v34 }
 0x338   : > { %v1317_v14 = vmul.f32 %v3215_v20, %v1294_v55 }
 0x33a   : > { %v1262_v13 = vpop.permute.xlu0 %1261  ;;  %v1344_v53 = vsel %vm1328_vm2, %v1317_v14, 0.0  ;;  %v2609_v14 = vpop.eup %2608 }
 0x33b   : > { %v1299_v33 = vmul.f32 %v2599_v2, %v1262_v13  ;;  %1345 = vadd.xlane.f32.xlu0 %v1344_v53  ;;  %v2611_v53 = vpop.eup %2610 }
 0x33d   : > { %v1322_v37 = vmul.f32 %v3215_v20, %v1299_v33 }
 0x33e   : > { %v1258_v30 = vpop.permute.xlu0 %1257 }
 0x33f   : > { %v1297_v50 = vmul.f32 %v2601_v22, %v1258_v30  ;;  %v1359_v41 = vsel %vm1328_vm2, %v1322_v37, 0.0  ;;  %v2613_v30 = vpop.eup %2612 }
 0x340   : > { %v1264_v39 = vpop.permute.xlu1 %1263  ;;  %1360 = vadd.xlane.f32.xlu1 %v1359_v41 }
 0x341   : > { %v1300_v19 = vmul.f32 %v2603_v3, %v1264_v39  ;;  %v1320_v45 = vmul.f32 %v3215_v20, %v1297_v50 }
 0x343   : > { %v1353_v58 = vsel %vm1328_vm2, %v1320_v45, 0.0  ;;  %v1323_v21 = vmul.f32 %v3215_v20, %v1300_v19  ;;  %v1404_v45 = vadd.s32 16, %v2961_v36 }
 0x344   : > { %v1260_v42 = vpop.permute.xlu1 %1259  ;;  %1354 = vadd.xlane.f32.xlu1 %v1353_v58  ;;  %v3263_v58 = vstv %s2285_s27 }
 0x345   : > { %v1298_v8 = vmul.f32 %v2605_v25, %v1260_v42  ;;  %v1362_v47 = vsel %vm1328_vm2, %v1323_v21, 0.0  ;;  %v1421_v21 = vadd.s32 %v3263_v58, %v1404_v45  ;;  %v3266_v25 = vld [vmem:[#allocation5] ss:$0 sm:$0xff]  ;;  %v1403_v42 = vadd.s32 8, %v2961_v36 }
 0x346   : > { %1363 = vadd.xlane.f32.xlu0 %v1362_v47  ;;  %v1419_v47 = vadd.s32 %v3263_v58, %v2961_v36  ;;  %v1407_v45 = vadd.s32 40, %v2961_v36 }
 0x347   : > { %v1321_v63 = vmul.f32 %v3215_v20, %v1298_v8  ;;  %vm1437_vm3 = vcmp.lt.s32.totalorder %v1421_v21, 300 }
 0x348   : > { %vm1435_vm5 = vcmp.lt.s32.totalorder %v1419_v47, 300 }
 0x349   : > { %v1356_v24 = vsel %vm1328_vm2, %v1321_v63, 0.0 }
 0x34a   : > { %1357 = vadd.xlane.f32.xlu0 %v1356_v24  ;;  %v1420_v24 = vadd.s32 %v3263_v58, %v1403_v42 }
 0x34c   : > { %vm1436_vm6 = vcmp.lt.s32.totalorder %v1420_v24, 300 }
 0x34d   : > { %v1266_v0 = vpop.permute.xlu0 %1265 }
 0x34e   : > { %v1301_v55 = vmul.f32 %v2607_v51, %v1266_v0 }
 0x350   : > { %v1324_v34 = vmul.f32 %v3215_v20, %v1301_v55 }
 0x351   : > { %v1270_v31 = vpop.permute.xlu0 %1269 }
 0x352   : > { %v1303_v2 = vmul.f32 %v2609_v14, %v1270_v31  ;;  %v1365_v13 = vsel %vm1328_vm2, %v1324_v34, 0.0 }
 0x353   : > { %v1268_v27 = vpop.permute.xlu1 %1267  ;;  %1366 = vadd.xlane.f32.xlu1 %v1365_v13 }
 0x354   : > { %v1302_v33 = vmul.f32 %v2611_v53, %v1268_v27  ;;  %v1326_v37 = vmul.f32 %v3215_v20, %v1303_v2 }
 0x356   : > { %v1371_v22 = vsel %vm1328_vm2, %v1326_v37, 0.0  ;;  %v1325_v16 = vmul.f32 %v3215_v20, %v1302_v33  ;;  %v1408_v33 = vadd.s32 48, %v2961_v36 }
 0x357   : > { %v1272_v50 = vpop.permute.xlu1 %1271  ;;  %1372 = vadd.xlane.f32.xlu1 %v1371_v22 }
 0x358   : > { %v1304_v41 = vmul.f32 %v2613_v30, %v1272_v50  ;;  %v1368_v3 = vsel %vm1328_vm2, %v1325_v16, 0.0  ;;  %v1425_v22 = vadd.s32 %v3263_v58, %v1408_v33  ;;  %v1406_v16 = vadd.s32 32, %v2961_v36 }
 0x359   : > { %1369 = vadd.xlane.f32.xlu0 %v1368_v3  ;;  %v1409_v30 = vadd.s32 56, %v2961_v36 }
 0x35a   : > { %v1327_v39 = vmul.f32 %v3215_v20, %v1304_v41  ;;  %v1405_v20 = vadd.s32 24, %v2961_v36  ;;  %vm1441_vm8 = vcmp.lt.s32.totalorder %v1425_v22, 300  ;;  %v1423_v41 = vadd.s32 %v3263_v58, %v1406_v16 }
 0x35c   : > { %v1374_v19 = vsel %vm1328_vm2, %v1327_v39, 0.0  ;;  %v1422_v55 = vadd.s32 %v3263_v58, %v1405_v20  ;;  %vm1439_vm9 = vcmp.lt.s32.totalorder %v1423_v41, 300  ;;  %v1424_v20 = vadd.s32 %v3263_v58, %v1407_v45 }
 0x35d   : > { %1375 = vadd.xlane.f32.xlu0 %v1374_v19  ;;  %v1426_v19 = vadd.s32 %v3263_v58, %v1409_v30 }
 0x35e   : > { %vm1438_vm7 = vcmp.lt.s32.totalorder %v1422_v55, 300  ;;  %vm1440_vm11 = vcmp.lt.s32.totalorder %v1424_v20, 300 }
 0x35f   : > { %vm1442_vm10 = vcmp.lt.s32.totalorder %v1426_v19, 300 }
 0x3a9   : > { %v1337_v8 = vpop.xlane.xlu0 %1336 }
 0x3aa   : > { %v1386_v63 = vadd.f32 %v3266_v25, %v1337_v8 }
 0x3ac   : > { %v3279_v51 = vsel %vm1437_vm3, %v1386_v63, -1e+30  ;;  %v1412_v63 = vadd.s32 80, %v2961_v36 }
 0x3ad   : > { %1471 = vst.msk [vmem:[%s3275_s13 + $0x10] sm:$0xff] %vm1468_vm4, %v3279_v51  ;;  %v1331_v0 = vpop.xlane.xlu0 %1330 }
 0x3ae   : > { %v1384_v34 = vadd.f32 %v3266_v25, %v1331_v0 }
 0x3af   : > { %v1334_v14 = vpop.xlane.xlu1 %1333 }
 0x3b0   : > { %v3286_v31 = vsel %vm1435_vm5, %v1384_v34, -1e+30  ;;  %v1385_v2 = vadd.f32 %v3266_v25, %v1334_v14  ;;  %v1429_v34 = vadd.s32 %v3263_v58, %v1412_v63  ;;  %v1410_v14 = vadd.s32 64, %v2961_v36 }
 0x3b1   : > { %1469 = vst.msk [vmem:[%s3275_s13] sm:$0xff] %vm1468_vm4, %v3286_v31  ;;  %v1340_v13 = vpop.xlane.xlu0 %1339  ;;  %vm1621_vm5 = vcmask 0  }
 0x3b2   : > { %v3292_v53 = vsel %vm1436_vm6, %v1385_v2, -1e+30  ;;  %v1387_v27 = vadd.f32 %v3266_v25, %v1340_v13  ;;  %v1413_v13 = vadd.s32 88, %v2961_v36  ;;  %vm1445_vm12 = vcmp.lt.s32.totalorder %v1429_v34, 300 }
 0x3b3   : > { %1470 = vst.msk [vmem:[%s3275_s13 + $0x8] sm:$0xff] %vm1468_vm4, %v3292_v53  ;;  %v1427_v22 = vadd.s32 %v3263_v58, %v1410_v14 }
 0x3b4   : > { %v3299_v37 = vsel %vm1438_vm7, %v1387_v27, -1e+30  ;;  %v1430_v30 = vadd.s32 %v3263_v58, %v1413_v13  ;;  %v1415_v13 = vadd.s32 104, %v2961_v36 }
 0x3b5   : > { %1472 = vst.msk [vmem:[%s3275_s13 + $0x18] sm:$0xff] %vm1468_vm4, %v3299_v37  ;;  %vm1443_vm13 = vcmp.lt.s32.totalorder %v1427_v22, 300 }
 0x3b6   : > { %vm1446_vm14 = vcmp.lt.s32.totalorder %v1430_v30, 300 }
 0x3ba   : > { %v1349_v50 = vpop.xlane.xlu1 %1348 }
 0x3bb   : > { %v1390_v3 = vadd.f32 %v3266_v25, %v1349_v50  ;;  %v1411_v50 = vadd.s32 72, %v2961_v36 }
 0x3bd   : > { %v3309_v39 = vsel %vm1441_vm8, %v1390_v3, -1e+30 }
 0x3be   : > { %1475 = vst.msk [vmem:[%s3275_s13 + $0x30] sm:$0xff] %vm1468_vm4, %v3309_v39  ;;  %v1343_v21 = vpop.xlane.xlu1 %1342 }
 0x3bf   : > { %v1388_v42 = vadd.f32 %v3266_v25, %v1343_v21  ;;  %v1428_v21 = vadd.s32 %v3263_v58, %v1411_v50  ;;  %v1432_v50 = vadd.s32 %v3263_v58, %v1415_v13 }
 0x3c0   : > { %v1352_v47 = vpop.xlane.xlu0 %1351 }
 0x3c1   : > { %v3317_v8 = vsel %vm1439_vm9, %v1388_v42, -1e+30  ;;  %v1391_v24 = vadd.f32 %v3266_v25, %v1352_v47  ;;  %vm1444_vm15 = vcmp.lt.s32.totalorder %v1428_v21, 300  ;;  %v1487_v21 = vsel %vm1468_vm4, %v3279_v51, -inf }
 0x3c2   : > { %1473 = vst.msk [vmem:[%s3275_s13 + $0x20] sm:$0xff] %vm1468_vm4, %v3317_v8  ;;  %vm1448_vm2 = vcmp.lt.s32.totalorder %v1432_v50, 300  ;;  %v1489_v13 = vsel %vm1468_vm4, %v3317_v8, -inf }
 0x3c3   : > { %v3325_v0 = vsel %vm1442_vm10, %v1391_v24, -1e+30 }
 0x3c4   : > { %1476 = vst.msk [vmem:[%s3275_s13 + $0x38] sm:$0xff] %vm1468_vm4, %v3325_v0  ;;  %v1346_v55 = vpop.xlane.xlu0 %1345 }
 0x3c5   : > { %v1389_v2 = vadd.f32 %v3266_v25, %v1346_v55  ;;  %v1414_v55 = vadd.s32 96, %v2961_v36 }
 0x3c7   : > { %v3334_v27 = vsel %vm1440_vm11, %v1389_v2, -1e+30  ;;  %v1431_v14 = vadd.s32 %v3263_v58, %v1414_v55  ;;  %v1416_v2 = vadd.s32 112, %v2961_v36 }
 0x3c8   : > { %1474 = vst.msk [vmem:[%s3275_s13 + $0x28] sm:$0xff] %vm1468_vm4, %v3334_v27 }
 0x3c9   : > { %v1361_v33 = vpop.xlane.xlu1 %1360  ;;  %vm1447_vm0 = vcmp.lt.s32.totalorder %v1431_v14, 300 }
 0x3ca   : > { %v1394_v16 = vadd.f32 %v3266_v25, %v1361_v33  ;;  %v1417_v33 = vadd.s32 120, %v2961_v36 }
 0x3cc   : > { %v3343_v41 = vsel %vm1445_vm12, %v1394_v16, -1e+30  ;;  %v1433_v16 = vadd.s32 %v3263_v58, %v1416_v2  ;;  %v1486_v2 = vsel %vm1468_vm4, %v3292_v53, -inf }
 0x3cd   : > { %1479 = vst.msk [vmem:[%s3275_s13 + $0x50] sm:$0xff] %vm1468_vm4, %v3343_v41  ;;  %v1355_v3 = vpop.xlane.xlu1 %1354  ;;  %v1501_v50 = vsel %vm1468_vm4, %v3343_v41, -inf }
 0x3ce   : > { %v1392_v19 = vadd.f32 %v3266_v25, %v1355_v3  ;;  %v1434_v3 = vadd.s32 %v3263_v58, %v1417_v33  ;;  %vm1449_vm1 = vcmp.lt.s32.totalorder %v1433_v16, 300  ;;  %v1485_v58 = vsel %vm1468_vm4, %v3286_v31, -inf }
 0x3cf   : > { %v1364_v45 = vpop.xlane.xlu0 %1363  ;;  %v1495_v33 = vsel %vm1468_vm4, %v3325_v0, -inf  ;;  %v1488_v16 = vsel %vm1468_vm4, %v3299_v37, -inf }
 0x3d0   : > { %v3350_v42 = vsel %vm1443_vm13, %v1392_v19, -1e+30  ;;  %v1395_v47 = vadd.f32 %v3266_v25, %v1364_v45  ;;  %vm1450_vm3 = vcmp.lt.s32.totalorder %v1434_v3, 300  ;;  %v1496_v62 = vmax.f32 %v1488_v16, %v1495_v33 }
 0x3d1   : > { %1477 = vst.msk [vmem:[%s3275_s13 + $0x40] sm:$0xff] %vm1468_vm4, %v3350_v42 }
 0x3d2   : > { %v3356_v20 = vsel %vm1446_vm14, %v1395_v47, -1e+30  ;;  %v1491_v47 = vsel %vm1468_vm4, %v3334_v27, -inf }
 0x3d3   : > { %1480 = vst.msk [vmem:[%s3275_s13 + $0x58] sm:$0xff] %vm1468_vm4, %v3356_v20  ;;  %v1358_v63 = vpop.xlane.xlu0 %1357  ;;  %v1503_v11 = vsel %vm1468_vm4, %v3356_v20, -inf }
 0x3d4   : > { %v1393_v24 = vadd.f32 %v3266_v25, %v1358_v63  ;;  %v1504_v29 = vmax.f32 %v1496_v62, %v1503_v11 }
 0x3d6   : > { %v3363_v34 = vsel %vm1444_vm15, %v1393_v24, -1e+30  ;;  %v1493_v24 = vsel %vm1468_vm4, %v3309_v39, -inf }
 0x3d7   : > { %1478 = vst.msk [vmem:[%s3275_s13 + $0x48] sm:$0xff] %vm1468_vm4, %v3363_v34 }
 0x3dc   : > { %v1367_v22 = vpop.xlane.xlu1 %1366 }
 0x3dd   : > { %v1396_v30 = vadd.f32 %v3266_v25, %v1367_v22  ;;  %v1499_v22 = vsel %vm1468_vm4, %v3363_v34, -inf }
 0x3df   : > { %v3376_v19 = vsel %vm1447_vm0, %v1396_v30, -1e+30  ;;  %v1492_v30 = vmax.f32 %v1486_v2, %v1491_v47  ;;  %v1490_v2 = vmax.f32 %v1485_v58, %v1489_v13 }
 0x3e0   : > { %1481 = vst.msk [vmem:[%s3275_s13 + $0x60] sm:$0xff] %vm1468_vm4, %v3376_v19  ;;  %v1373_v45 = vpop.xlane.xlu1 %1372 }
 0x3e1   : > { %v1398_v36 = vadd.f32 %v3266_v25, %v1373_v45  ;;  %v1500_v61 = vmax.f32 %v1492_v30, %v1499_v22 }
 0x3e2   : > { %v1370_v63 = vpop.xlane.xlu0 %1369 }
 0x3e3   : > { %v3390_v55 = vsel %vm1449_vm1, %v1398_v36, -1e+30  ;;  %v1397_v14 = vadd.f32 %v3266_v25, %v1370_v63  ;;  %v1494_v36 = vmax.f32 %v1487_v21, %v1493_v24  ;;  %v1497_v63 = vsel %vm1468_vm4, %v3350_v42, -inf }
 0x3e4   : > { %1483 = vst.msk [vmem:[%s3275_s13 + $0x70] sm:$0xff] %vm1468_vm4, %v3390_v55  ;;  %v1505_v24 = vsel %vm1468_vm4, %v3376_v19, -inf  ;;  %v1509_v44 = vsel %vm1468_vm4, %v3390_v55, -inf  ;;  %v1498_v40 = vmax.f32 %v1490_v2, %v1497_v63 }
 0x3e5   : > { %v3408_v45 = vsel %vm1448_vm2, %v1397_v14, -1e+30  ;;  %v1502_v21 = vmax.f32 %v1494_v36, %v1501_v50 }
 0x3e6   : > { %1482 = vst.msk [vmem:[%s3275_s13 + $0x68] sm:$0xff] %vm1468_vm4, %v3408_v45  ;;  %v1507_v10 = vsel %vm1468_vm4, %v3408_v45, -inf  ;;  %v1376_v47 = vpop.xlane.xlu0 %1375 }
 0x3e7   : > { %v1399_v14 = vadd.f32 %v3266_v25, %v1376_v47  ;;  %v1508_v28 = vmax.f32 %v1500_v61, %v1507_v10  ;;  %v1506_v25 = vmax.f32 %v1498_v40, %v1505_v24  ;;  %v1510_v13 = vmax.f32 %v1502_v21, %v1509_v44  ;;  %v1522_v10 = vld [vmem:[#allocation2] sm:$0x1] }
 0x3e9   : > { %v3425_v18 = vsel %vm1450_vm3, %v1399_v14, -1e+30  ;;  %v1513_v22 = vmax.f32 %v1506_v25, %v1508_v28 }
 0x3ea   : > { %1484 = vst.msk [vmem:[%s3275_s13 + $0x78] sm:$0xff] %vm1468_vm4, %v3425_v18  ;;  %v1511_v58 = vsel %vm1468_vm4, %v3425_v18, -inf }
 0x3eb   : > { %v1512_v33 = vmax.f32 %v1504_v29, %v1511_v58 }
 0x3ed   : > { %v1514_v16 = vmax.f32 %v1510_v13, %v1512_v33 }
 0x3ef   : > { %v1515_v30 = vmax.f32 %v1513_v22, %v1514_v16 }
 0x3f1   : > { %v1516_v50 = vrot.slane %v1515_v30, 4 }
 0x3f3   : > { %v1517_v36 = vmax.f32 %v1515_v30, %v1516_v50 }
 0x3f5   : > { %v1518_v63 = vrot.slane %v1517_v36, 2 }
 0x3f7   : > { %v1519_v62 = vmax.f32 %v1517_v36, %v1518_v63 }
 0x3f9   : > { %v1520_v61 = vrot.slane %v1519_v62, 1 }
 0x3fb   : > { %v1521_v11 = vmax.f32 %v1519_v62, %v1520_v61 }
 0x3fd   : > { %v1523_v3 = vmax.f32 %v1522_v10, %v1521_v11 }
 0x3ff   : > { %v3433_v47 = vrot.slane %v1523_v3, %v2965_v38  ;;  %1753 = vst.msk [vmem:[#allocation2] sm:$0x1] %vm1621_vm5, %v1523_v3  ;;  %v1524_v63 = vsub.f32 %v1522_v10, %v1523_v3 }
 0x401   : > { %v1533_v29 = vsub.f32 %v3286_v31, %v3433_v47  ;;  %v1534_v28 = vsub.f32 %v3292_v53, %v3433_v47  ;;  %v1535_v40 = vsub.f32 %v3279_v51, %v3433_v47  ;;  %v1536_v44 = vsub.f32 %v3299_v37, %v3433_v47 }
 0x402   : > { %v1537_v2 = vsub.f32 %v3317_v8, %v3433_v47  ;;  %v1538_v24 = vsub.f32 %v3334_v27, %v3433_v47  ;;  %v1539_v31 = vsub.f32 %v3309_v39, %v3433_v47  ;;  %v1543_v51 = vsub.f32 %v3343_v41, %v3433_v47 }
 0x403   : > { %v1549_v14 = vmul.f32 1.442695, %v1533_v29  ;;  %v1551_v21 = vmul.f32 1.442695, %v1534_v28  ;;  %v1553_v58 = vmul.f32 1.442695, %v1535_v40  ;;  %v1540_v37 = vsub.f32 %v3325_v0, %v3433_v47 }
 0x404   : > { %v1555_v25 = vmul.f32 1.442695, %v1536_v44  ;;  %v1557_v53 = vmul.f32 1.442695, %v1537_v2  ;;  %v1559_v8 = vmul.f32 1.442695, %v1538_v24  ;;  %v1541_v27 = vsub.f32 %v3350_v42, %v3433_v47 }
 0x405   : > { %2614 = vpow2.f32 %v1549_v14  ;;  %v1561_v13 = vmul.f32 1.442695, %v1539_v31  ;;  %v1545_v33 = vsub.f32 %v3376_v19, %v3433_v47  ;;  %v1569_v39 = vmul.f32 1.442695, %v1543_v51 }
 0x406   : > { %2616 = vpow2.f32 %v1551_v21  ;;  %v1542_v22 = vsub.f32 %v3363_v34, %v3433_v47  ;;  %v1563_v41 = vmul.f32 1.442695, %v1540_v37  ;;  %v1565_v16 = vmul.f32 1.442695, %v1541_v27 }
 0x407   : > { %2618 = vpow2.f32 %v1553_v58  ;;  %v1547_v0 = vsub.f32 %v3390_v55, %v3433_v47  ;;  %v1573_v30 = vmul.f32 1.442695, %v1545_v33  ;;  %v1544_v42 = vsub.f32 %v3356_v20, %v3433_v47 }
 0x408   : > { %2620 = vpow2.f32 %v1555_v25  ;;  %v1567_v50 = vmul.f32 1.442695, %v1542_v22  ;;  %v1546_v55 = vsub.f32 %v3408_v45, %v3433_v47  ;;  %v1525_v10 = vmul.f32 1.442695, %v1524_v63 }
 0x409   : > { %2622 = vpow2.f32 %v1557_v53  ;;  %v1577_v34 = vmul.f32 1.442695, %v1547_v0  ;;  %v1571_v11 = vmul.f32 1.442695, %v1544_v42  ;;  %v1548_v2 = vsub.f32 %v3425_v18, %v3433_v47 }
 0x40a   : > { %2624 = vpow2.f32 %v1559_v8  ;;  %v1575_v14 = vmul.f32 1.442695, %v1546_v55 }
 0x40b   : > { %2626 = vpow2.f32 %v1561_v13  ;;  %v1579_v51 = vmul.f32 1.442695, %v1548_v2 }
 0x40c   : > { %2628 = vpow2.f32 %v1569_v39 }
 0x40d   : > { %2630 = vpow2.f32 %v1563_v41 }
 0x40e   : > { %2632 = vpow2.f32 %v1565_v16 }
 0x40f   : > { %2634 = vpow2.f32 %v1573_v30 }
 0x410   : > { %2636 = vpow2.f32 %v1567_v50 }
 0x411   : > { %2638 = vpow2.f32 %v1577_v34 }
 0x412   : > { %v2615_v36 = vpop.eup %2614  ;;  %2640 = vpow2.f32 %v1571_v11 }
 0x413   : > { %v2617_v19 = vpop.eup %2616  ;;  %v1583_v62 = vsel %vm1468_vm4, %v2615_v36, 0.0  ;;  %1636 = vperm.xlu1 %2478, %v2615_v36   ;;  %2642 = vpow2.f32 %v1525_v10 }
 0x414   : > { %v2619_v61 = vpop.eup %2618  ;;  %v1584_v29 = vsel %vm1468_vm4, %v2617_v19, 0.0  ;;  %1641 = vperm.xlu0 %2479, %v2617_v19   ;;  %2644 = vpow2.f32 %v1575_v14 }
 0x415   : > { %v2621_v20 = vpop.eup %2620  ;;  %v1585_v28 = vadd.f32 %v1584_v29, %v1583_v62  ;;  %v1586_v40 = vsel %vm1468_vm4, %v2619_v61, 0.0  ;;  %2646 = vpow2.f32 %v1579_v51 }
 0x416   : > { %v2623_v44 = vpop.eup %2622  ;;  %v1588_v45 = vsel %vm1468_vm4, %v2621_v20, 0.0 }
 0x417   : > { %v1587_v3 = vadd.f32 %v1586_v40, %v1585_v28  ;;  %1646 = vperm.xlu1 %2478, %v2619_v61   ;;  %v2625_v21 = vpop.eup %2624  ;;  %v1590_v58 = vsel %vm1468_vm4, %v2623_v44, 0.0 }
 0x418   : > { %v2627_v25 = vpop.eup %2626  ;;  %v1592_v37 = vsel %vm1468_vm4, %v2625_v21, 0.0 }
 0x419   : > { %v1589_v24 = vadd.f32 %v1588_v45, %v1587_v3  ;;  %v2629_v53 = vpop.eup %2628  ;;  %v1594_v18 = vsel %vm1468_vm4, %v2627_v25, 0.0 }
 0x41a   : > { %v2631_v8 = vpop.eup %2630  ;;  %1686 = vperm.xlu0 %2479, %v2629_v53   ;;  %v1602_v19 = vsel %vm1468_vm4, %v2629_v53, 0.0 }
 0x41b   : > { %v1591_v31 = vadd.f32 %v1590_v58, %v1589_v24  ;;  %1651 = vperm.xlu1 %2478, %v2621_v20   ;;  %v2633_v47 = vpop.eup %2632  ;;  %v1596_v39 = vsel %vm1468_vm4, %v2631_v8, 0.0  ;;  %v1581_v58 = vld [vmem:[#allocation3] sm:$0x1] }
 0x41c   : > { %v2635_v33 = vpop.eup %2634  ;;  %v1598_v16 = vsel %vm1468_vm4, %v2633_v47, 0.0 }
 0x41d   : > { %v1593_v27 = vadd.f32 %v1592_v37, %v1591_v31  ;;  %v2637_v22 = vpop.eup %2636  ;;  %v1606_v11 = vsel %vm1468_vm4, %v2635_v33, 0.0 }
 0x41e   : > { %1696 = vperm.xlu0 %2479, %v2635_v33   ;;  %v2639_v30 = vpop.eup %2638  ;;  %v1600_v42 = vsel %vm1468_vm4, %v2637_v22, 0.0 }
 0x41f   : > { %v1595_v13 = vadd.f32 %v1594_v18, %v1593_v27  ;;  %1656 = vperm.xlu1 %2478, %v2623_v44   ;;  %v2641_v50 = vpop.eup %2640  ;;  %v1610_v44 = vsel %vm1468_vm4, %v2639_v30, 0.0 }
 0x420   : > { %v2643_v34 = vpop.eup %2642  ;;  %v1604_v62 = vsel %vm1468_vm4, %v2641_v50, 0.0 }
 0x421   : > { %v1597_v41 = vadd.f32 %v1596_v39, %v1595_v13  ;;  %v2645_v61 = vpop.eup %2644  ;;  %v1582_v31 = vmul.f32 %v2643_v34, %v1581_v58  ;;  %v4074_v58 = vmax.f32 %v3115_v9, 0.0 }
 0x422   : > { %1706 = vperm.xlu0 %2479, %v2639_v30   ;;  %v1608_v20 = vsel %vm1468_vm4, %v2645_v61, 0.0  ;;  %v2647_v28 = vpop.eup %2646 }
 0x423   : > { %v1599_v0 = vadd.f32 %v1598_v16, %v1597_v41  ;;  %1661 = vperm.xlu1 %2478, %v2625_v21   ;;  %v1612_v3 = vsel %vm1468_vm4, %v2647_v28, 0.0 }
 0x425   : > { %v1601_v36 = vadd.f32 %v1600_v42, %v1599_v0 }
 0x426   : > { %1626 = vperm.xlu0 %2479, %v2643_v34  }
 0x427   : > { %v1603_v63 = vadd.f32 %v1602_v19, %v1601_v36  ;;  %1666 = vperm.xlu1 %2478, %v2627_v25  }
 0x429   : > { %v1605_v55 = vadd.f32 %v1604_v62, %v1603_v63  ;;  %v4067_v63 = vmax.f32 %v3076_v23, 0.0 }
 0x42b   : > { %v1607_v29 = vadd.f32 %v1606_v11, %v1605_v55  ;;  %1671 = vperm.xlu1 %2478, %v2631_v8  }
 0x42d   : > { %v1609_v40 = vadd.f32 %v1608_v20, %v1607_v29  ;;  %v4070_v29 = vmax.f32 %v3091_v35, 0.0 }
 0x42f   : > { %v1611_v10 = vadd.f32 %v1610_v44, %v1609_v40  ;;  %1676 = vperm.xlu1 %2478, %v2633_v47  }
 0x431   : > { %v1613_v2 = vadd.f32 %v1612_v3, %v1611_v10 }
 0x433   : > { %v1614_v14 = vrot.slane %v1613_v2, 4  ;;  %1681 = vperm.xlu1 %2478, %v2637_v22  }
 0x435   : > { %v1615_v45 = vadd.f32 %v1614_v14, %v1613_v2  ;;  %v4073_v14 = vmax.f32 %v3112_v5, 0.0 }
 0x437   : > { %v1616_v21 = vrot.slane %v1615_v45, 2  ;;  %1691 = vperm.xlu1 %2478, %v2641_v50  }
 0x439   : > { %v1617_v24 = vadd.f32 %v1616_v21, %v1615_v45 }
 0x43b   : > { %v1618_v25 = vrot.slane %v1617_v24, 1  ;;  %1701 = vperm.xlu1 %2478, %v2645_v61  }
 0x43d   : > { %v1619_v53 = vadd.f32 %v1618_v25, %v1617_v24 }
 0x43f   : > { %v1620_v51 = vadd.f32 %v1619_v53, %v1582_v31  ;;  %1711 = vperm.xlu1 %2478, %v2647_v28   ;;  %v4071_v28 = vmax.f32 %v3100_v52, 0.0 }
 0x441   : > { %1622 = vst.msk [vmem:[#allocation3] sm:$0x1] %vm1621_vm5, %v1620_v51 }
 0x48e   : > { %v1637_v37 = vpop.permute.xlu1 %1636 }
 0x48f   : > { %v1642_v18 = vpop.permute.xlu0 %1641  ;;  %v1714_v33 = vmul.f32 %v1637_v37, %v921_v48 }
 0x490   : > { %v1715_v13 = vmul.f32 %v1642_v18, %v922_v49 }
 0x492   : > { %v1647_v8 = vpop.permute.xlu1 %1646  ;;  %v1730_v41 = vadd.f32 %v1715_v13, %v1714_v33 }
 0x493   : > { %v1716_v22 = vmul.f32 %v1647_v8, %v923_v59  ;;  %v4066_v59 = vmax.f32 %v3067_v15, 0.0 }
 0x495   : > { %v1731_v30 = vadd.f32 %v1730_v41, %v1716_v22  ;;  %v1687_v57 = vpop.permute.xlu0 %1686 }
 0x496   : > { %v1652_v27 = vpop.permute.xlu1 %1651 }
 0x497   : > { %v1717_v16 = vmul.f32 %v1652_v27, %v924_v60  ;;  %v1623_v27 = vld [vmem:[#allocation4] sm:$0x1] }
 0x499   : > { %v1732_v50 = vadd.f32 %v1731_v30, %v1717_v16  ;;  %v1697_v61 = vpop.permute.xlu0 %1696 }
 0x49a   : > { %v1657_v47 = vpop.permute.xlu1 %1656  ;;  %v1726_v23 = vmul.f32 %v1697_v61, %v4071_v28 }
 0x49b   : > { %v1718_v42 = vmul.f32 %v1657_v47, %v925_v6 }
 0x49d   : > { %v1733_v43 = vadd.f32 %v1732_v50, %v1718_v42  ;;  %v1707_v44 = vpop.permute.xlu0 %1706 }
 0x49e   : > { %v1662_v39 = vpop.permute.xlu1 %1661  ;;  %v1728_v32 = vmul.f32 %v1707_v44, %v4073_v14 }
 0x49f   : > { %v1719_v46 = vmul.f32 %v1662_v39, %v926_v7 }
 0x4a1   : > { %v1734_v54 = vadd.f32 %v1733_v43, %v1719_v46  ;;  %v1627_v53 = vpop.permute.xlu0 %1626 }
 0x4a2   : > { %v1667_v0 = vpop.permute.xlu1 %1666  ;;  %v1632_v37 = vrot.slane %v1627_v53, %v2965_v38 }
 0x4a3   : > { %v1720_v48 = vmul.f32 %v1667_v0, %v927_v17  ;;  %v1724_v17 = vmul.f32 %v1687_v57, %v4069_v12 }
 0x4a4   : > { %v1633_v18 = vmul.f32 %v1632_v37, %v1623_v27 }
 0x4a5   : > { %v1735_v19 = vadd.f32 %v1734_v54, %v1720_v48 }
 0x4a6   : > { %v1672_v49 = vpop.permute.xlu1 %1671 }
 0x4a7   : > { %v1721_v36 = vmul.f32 %v1672_v49, %v4066_v59 }
 0x4a9   : > { %v1736_v6 = vadd.f32 %v1735_v19, %v1721_v36 }
 0x4aa   : > { %v1677_v60 = vpop.permute.xlu1 %1676 }
 0x4ab   : > { %v1722_v1 = vmul.f32 %v1677_v60, %v4067_v63 }
 0x4ad   : > { %v1737_v62 = vadd.f32 %v1736_v6, %v1722_v1 }
 0x4ae   : > { %v1682_v34 = vpop.permute.xlu1 %1681 }
 0x4af   : > { %v1723_v7 = vmul.f32 %v1682_v34, %v4068_v4 }
 0x4b1   : > { %v1738_v55 = vadd.f32 %v1737_v62, %v1723_v7 }
 0x4b2   : > { %v1692_v11 = vpop.permute.xlu1 %1691 }
 0x4b3   : > { %v1739_v15 = vadd.f32 %v1738_v55, %v1724_v17  ;;  %v1725_v20 = vmul.f32 %v1692_v11, %v4070_v29 }
 0x4b5   : > { %v1740_v40 = vadd.f32 %v1739_v15, %v1725_v20 }
 0x4b6   : > { %v1702_v10 = vpop.permute.xlu1 %1701 }
 0x4b7   : > { %v1741_v3 = vadd.f32 %v1740_v40, %v1726_v23  ;;  %v1727_v2 = vmul.f32 %v1702_v10, %v4072_v26 }
 0x4b9   : > { %v1742_v45 = vadd.f32 %v1741_v3, %v1727_v2 }
 0x4ba   : > { %v1712_v21 = vpop.permute.xlu1 %1711 }
 0x4bb   : > { %v1743_v24 = vadd.f32 %v1742_v45, %v1728_v32  ;;  %v1729_v35 = vmul.f32 %v1712_v21, %v4074_v58 }
 0x4bd   : > { %v1744_v25 = vadd.f32 %v1743_v24, %v1729_v35 }
 0x4bf   : > { %v1745_v31 = vrot.slane %v1744_v25, 4 }
 0x4c1   : > { %v1746_v52 = vadd.f32 %v1745_v31, %v1744_v25 }
 0x4c3   : > { %v1747_v51 = vrot.slane %v1746_v52, 2 }
 0x4c5   : > { %v1748_v8 = vadd.f32 %v1747_v51, %v1746_v52 }
 0x4c7   : > { %v1749_v56 = vrot.slane %v1748_v8, 1 }
 0x4c9   : > { %v1750_v47 = vadd.f32 %v1749_v56, %v1748_v8  ;;  %1757 = sbr.rel (%p2286_p5) target bundleno = 1569 (0x621), region = 72 }
 0x4cb   : > { %v1751_v5 = vadd.f32 %v1750_v47, %v1633_v18 }
 0x4cd   : > { %1752 = vst [vmem:[#allocation4] sm:$0x1] %v1751_v5 }
 0x4ce   : > { %v1758_v13 = vld [vmem:[#allocation3] sm:$0x1]  ;;  %v2787_v9 = vmov 0   ;;  %v2788_v33 = vmov 0.0   ;;  %vm2789_vm6 = vmmov 0   ;;  %v1786_v22 = vld [vmem:[%s4053_s9 + $0x78] sm:$0xff] }
 0x4cf   : > { %2648 = vset.pattern.permute.xlu0 %v2787_v9  ;;  %2649 = vrcp.f32 %v1758_v13  ;;  %2421 = vmatprep.subr.mxu0 %v2788_v33  ;;  %v1785_v41 = vld [vmem:[%s4053_s9 + $0x70] sm:$0xff]  ;;  %v1784_v16 = vld [vmem:[%s4053_s9 + $0x68] sm:$0xff]  ;;  %v1783_v0 = vld [vmem:[%s4053_s9 + $0x60] sm:$0xff]  ;;  %vm1858_vm7 = vcmask 24576  }
 0x4d0   : > { %2453 = vmatprep.mubr.msk.f32.mxu0 %vm2789_vm6, %v2788_v33  ;;  %2422 = vmatpush3.msra.mxu0 %v1786_v22  ;;  %v1860_v30 = vld [vmem:[%s4056_s12] sm:$0xff]  ;;  %v1861_v42 = vld [vmem:[%s4056_s12 + $0x8] sm:$0xff]  ;;  %v1862_v50 = vld [vmem:[%s4056_s12 + $0x10] sm:$0xff] }
 0x4d1   : > { %2423 = vmatprep.subr.mxu0 %v2788_v33  ;;  %v3547_v46 = vld [vmem:[#allocation2] ss:$0 sm:$0xff]  ;;  %v1782_v49 = vld [vmem:[%s4053_s9 + $0x58] sm:$0xff]  ;;  %v1781_v54 = vld [vmem:[%s4053_s9 + $0x50] sm:$0xff] }
 0x4d2   : > { %2424 = vmatpush3.msra.mxu0 %v1785_v41  ;;  %v1863_v43 = vld [vmem:[%s4056_s12 + $0x18] sm:$0xff]  ;;  %v1864_v48 = vld [vmem:[%s4056_s12 + $0x20] sm:$0xff]  ;;  %v1865_v59 = vld [vmem:[%s4056_s12 + $0x28] sm:$0xff]  ;;  %v1915_v36 = vsub.f32 %v1860_v30, %v3547_v46  ;;  %v1916_v57 = vsub.f32 %v1861_v42, %v3547_v46  ;;  %v1917_v60 = vsub.f32 %v1862_v50, %v3547_v46 }
 0x4d3   : > { %2425 = vmatprep.subr.mxu0 %v2788_v33  ;;  %v1866_v19 = vld [vmem:[%s4056_s12 + $0x30] sm:$0xff]  ;;  %v1918_v63 = vsub.f32 %v1863_v43, %v3547_v46  ;;  %v1780_v1 = vld [vmem:[%s4053_s9 + $0x48] sm:$0xff]  ;;  %v1867_v6 = vld [vmem:[%s4056_s12 + $0x38] sm:$0xff]  ;;  %v1919_v34 = vsub.f32 %v1864_v48, %v3547_v46  ;;  %v1920_v7 = vsub.f32 %v1865_v59, %v3547_v46 }
 0x4d4   : > { %2426 = vmatpush3.msra.mxu0 %v1784_v16  ;;  %v1868_v62 = vld [vmem:[%s4056_s12 + $0x40] sm:$0xff]  ;;  %v1869_v4 = vld [vmem:[%s4056_s12 + $0x48] sm:$0xff]  ;;  %v1921_v12 = vsub.f32 %v1866_v19, %v3547_v46  ;;  %v1963_v17 = vmul.f32 1.442695, %v1915_v36  ;;  %v1965_v55 = vmul.f32 1.442695, %v1916_v57  ;;  %v1922_v29 = vsub.f32 %v1867_v6, %v3547_v46 }
 0x4d5   : > { %2427 = vmatprep.subr.mxu0 %v2788_v33  ;;  %v1779_v61 = vld [vmem:[%s4053_s9 + $0x40] sm:$0xff]  ;;  %v1967_v11 = vmul.f32 1.442695, %v1917_v60  ;;  %v1870_v15 = vld [vmem:[%s4056_s12 + $0x50] sm:$0xff]  ;;  %v1969_v20 = vmul.f32 1.442695, %v1918_v63  ;;  %v1923_v40 = vsub.f32 %v1868_v62, %v3547_v46  ;;  %v1924_v3 = vsub.f32 %v1869_v4, %v3547_v46 }
 0x4d6   : > { %2428 = vmatpush3.msra.mxu0 %v1783_v0  ;;  %v1778_v28 = vld [vmem:[%s4053_s9 + $0x38] sm:$0xff]  ;;  %2651 = vpow2.f32 %v1963_v17  ;;  %v1971_v44 = vmul.f32 1.442695, %v1919_v34  ;;  %v1872_v10 = vld [vmem:[%s4056_s12 + $0x60] sm:$0xff]  ;;  %v1973_v26 = vmul.f32 1.442695, %v1920_v7  ;;  %v1925_v32 = vsub.f32 %v1870_v15, %v3547_v46 }
 0x4d7   : > { %2429 = vmatprep.subr.mxu0 %v2788_v33  ;;  %v1871_v23 = vld [vmem:[%s4056_s12 + $0x58] sm:$0xff]  ;;  %2653 = vpow2.f32 %v1965_v55  ;;  %v1777_v2 = vld [vmem:[%s4053_s9 + $0x30] sm:$0xff]  ;;  %v1873_v14 = vld [vmem:[%s4056_s12 + $0x68] sm:$0xff]  ;;  %v1975_v45 = vmul.f32 1.442695, %v1921_v12  ;;  %v1927_v31 = vsub.f32 %v1872_v10, %v3547_v46 }
 0x4d8   : > { %2430 = vmatpush3.msra.mxu0 %v1782_v49  ;;  %2655 = vpow2.f32 %v1967_v11  ;;  %v1874_v21 = vld [vmem:[%s4056_s12 + $0x70] sm:$0xff]  ;;  %v1926_v24 = vsub.f32 %v1871_v23, %v3547_v46  ;;  %v1977_v58 = vmul.f32 1.442695, %v1922_v29  ;;  %v1776_v35 = vld [vmem:[%s4053_s9 + $0x28] sm:$0xff]  ;;  %v1875_v25 = vld [vmem:[%s4056_s12 + $0x78] sm:$0xff]  ;;  %v1928_v51 = vsub.f32 %v1873_v14, %v3547_v46 }
 0x4d9   : > { %2431 = vmatprep.subr.mxu0 %v2788_v33  ;;  %2657 = vpow2.f32 %v1969_v20  ;;  %v1979_v52 = vmul.f32 1.442695, %v1923_v40  ;;  %v1876_v53 = vld [vmem:[%s4056_s12 + $0x80] sm:$0xff]  ;;  %v1981_v37 = vmul.f32 1.442695, %v1924_v3  ;;  %v1877_v27 = vld [vmem:[%s4056_s12 + $0x88] sm:$0xff]  ;;  %v1929_v56 = vsub.f32 %v1874_v21, %v3547_v46 }
 0x4da   : > { %2432 = vmatpush3.msra.mxu0 %v1781_v54  ;;  %2659 = vpow2.f32 %v1971_v44  ;;  %v1775_v8 = vld [vmem:[%s4053_s9 + $0x20] sm:$0xff]  ;;  %v1983_v18 = vmul.f32 1.442695, %v1925_v32  ;;  %v1878_v47 = vld [vmem:[%s4056_s12 + $0x90] sm:$0xff]  ;;  %v1930_v5 = vsub.f32 %v1875_v25, %v3547_v46  ;;  %v1985_v13 = vmul.f32 1.442695, %v1926_v24 }
 0x4db   : > { %2433 = vmatprep.subr.mxu0 %v2788_v33  ;;  %2661 = vpow2.f32 %v1973_v26  ;;  %v1774_v9 = vld [vmem:[%s4053_s9 + $0x18] sm:$0xff]  ;;  %v1931_v41 = vsub.f32 %v1876_v53, %v3547_v46  ;;  %v1987_v16 = vmul.f32 1.442695, %v1927_v31  ;;  %v1880_v0 = vld [vmem:[%s4056_s12 + $0xa0] sm:$0xff]  ;;  %v1932_v30 = vsub.f32 %v1877_v27, %v3547_v46  ;;  %v1773_v50 = vld [vmem:[%s4053_s9 + $0x10] sm:$0xff] }
 0x4dc   : > { %v3520_v39 = vpop.eup %2649  ;;  %2434 = vmatpush3.msra.mxu0 %v1780_v1  ;;  %2663 = vpow2.f32 %v1975_v45  ;;  %v1879_v22 = vld [vmem:[%s4056_s12 + $0x98] sm:$0xff]  ;;  %v1989_v42 = vmul.f32 1.442695, %v1928_v51  ;;  %v1881_v49 = vld [vmem:[%s4056_s12 + $0xa8] sm:$0xff]  ;;  %v1933_v43 = vsub.f32 %v1878_v47, %v3547_v46  ;;  %v1991_v48 = vmul.f32 1.442695, %v1929_v56 }
 0x4dd   : > { %1763 = vperm.xlu0 %2648, %v3520_v39   ;;  %2435 = vmatprep.subr.mxu0 %v2788_v33  ;;  %2665 = vpow2.f32 %v1977_v58  ;;  %v3667_v54 = vrot.slane %v3520_v39, %v2965_v38  ;;  %v1882_v59 = vld [vmem:[%s4056_s12 + $0xb0] sm:$0xff]  ;;  %v1934_v36 = vsub.f32 %v1879_v22, %v3547_v46  ;;  %v1993_v57 = vmul.f32 1.442695, %v1930_v5  ;;  %v1772_v60 = vld [vmem:[%s4053_s9 + $0x8] sm:$0xff]  ;;  %v1883_v39 = vld [vmem:[%s4056_s12 + $0xb8] sm:$0xff] }
 0x4de   : > { %2436 = vmatpush3.msra.mxu0 %v1779_v61  ;;  %2667 = vpow2.f32 %v1979_v52  ;;  %v1935_v19 = vsub.f32 %v1880_v0, %v3547_v46  ;;  %v1995_v63 = vmul.f32 1.442695, %v1931_v41  ;;  %v1884_v6 = vld [vmem:[%s4056_s12 + $0xc0] sm:$0xff]  ;;  %v1936_v34 = vsub.f32 %v1881_v49, %v3547_v46  ;;  %v1885_v61 = vld [vmem:[%s4056_s12 + $0xc8] sm:$0xff]  ;;  %v1886_v15 = vld [vmem:[%s4056_s12 + $0xd0] sm:$0xff] }
 0x4df   : > { %2437 = vmatprep.subr.mxu0 %v2788_v33  ;;  %2669 = vpow2.f32 %v1981_v37  ;;  %v1997_v62 = vmul.f32 1.442695, %v1932_v30  ;;  %v1771_v4 = vld [vmem:[%s4053_s9] sm:$0xff]  ;;  %v1937_v12 = vsub.f32 %v1882_v59, %v3547_v46  ;;  %v1999_v17 = vmul.f32 1.442695, %v1933_v43  ;;  %v1887_v40 = vld [vmem:[%s4056_s12 + $0xd8] sm:$0xff] }
 0x4e0   : > { %2438 = vmatpush3.msra.mxu0 %v1778_v28  ;;  %2671 = vpow2.f32 %v1983_v18  ;;  %v1938_v29 = vsub.f32 %v1883_v39, %v3547_v46  ;;  %v2001_v20 = vmul.f32 1.442695, %v1934_v36  ;;  %v1939_v44 = vsub.f32 %v1884_v6, %v3547_v46  ;;  %v1889_v21 = vld [vmem:[%s4056_s12 + $0xe8] sm:$0xff]  ;;  %v1890_v31 = vld [vmem:[%s4056_s12 + $0xf0] sm:$0xff]  ;;  %v1892_v5 = vld [vmem:[%s4056_s12 + $0x100] sm:$0xff] }
 0x4e1   : > { %2439 = vmatprep.subr.mxu0 %v2788_v33  ;;  %2673 = vpow2.f32 %v1985_v13  ;;  %v2003_v10 = vmul.f32 1.442695, %v1935_v19  ;;  %v2005_v14 = vmul.f32 1.442695, %v1936_v34  ;;  %v1941_v24 = vsub.f32 %v1886_v15, %v3547_v46  ;;  %v1894_v49 = vld [vmem:[%s4056_s12 + $0x110] sm:$0xff] }
 0x4e2   : > { %2440 = vmatpush3.msra.mxu0 %v1777_v2  ;;  %2675 = vpow2.f32 %v1987_v16  ;;  %v1940_v2 = vsub.f32 %v1885_v61, %v3547_v46  ;;  %v2007_v58 = vmul.f32 1.442695, %v1937_v12  ;;  %v1942_v52 = vsub.f32 %v1887_v40, %v3547_v46  ;;  %v1893_v16 = vld [vmem:[%s4056_s12 + $0x108] sm:$0xff] }
 0x4e3   : > { %2441 = vmatprep.subr.mxu0 %v2788_v33  ;;  %v2652_v1 = vpop.eup %2651  ;;  %2677 = vpow2.f32 %v1989_v42  ;;  %v2009_v53 = vmul.f32 1.442695, %v1938_v29  ;;  %v2011_v56 = vmul.f32 1.442695, %v1939_v44  ;;  %v1944_v13 = vsub.f32 %v1889_v21, %v3547_v46 }
 0x4e4   : > { %2442 = vmatpush3.msra.mxu0 %v1776_v35  ;;  %v2654_v7 = vpop.eup %2653  ;;  %2679 = vpow2.f32 %v1991_v48  ;;  %v2064_v55 = vmul.f32 %v2652_v1, %v3667_v54  ;;  %v1945_v0 = vsub.f32 %v1890_v31, %v3547_v46  ;;  %v2015_v30 = vmul.f32 1.442695, %v1941_v24  ;;  %v1896_v1 = vld [vmem:[%s4056_s12 + $0x120] sm:$0xff] }
 0x4e5   : > { %2443 = vmatprep.subr.mxu0 %v2788_v33  ;;  %v2656_v11 = vpop.eup %2655  ;;  %2681 = vpow2.f32 %v1993_v57  ;;  %v2065_v28 = vmul.f32 %v2654_v7, %v3667_v54  ;;  %v2017_v48 = vmul.f32 1.442695, %v1942_v52  ;;  %v1895_v57 = vld [vmem:[%s4056_s12 + $0x118] sm:$0xff]  ;;  %v1948_v6 = vsub.f32 %v1893_v16, %v3547_v46  ;;  %v1897_v7 = vld [vmem:[%s4056_s12 + $0x128] sm:$0xff] }
 0x4e6   : > { %2444 = vmatpush3.msra.mxu0 %v1775_v8  ;;  %v2658_v23 = vpop.eup %2657  ;;  %2683 = vpow2.f32 %v1995_v63  ;;  %v2066_v3 = vmul.f32 %v2656_v11, %v3667_v54  ;;  %2112 = vst.msk [vmem:[%s4056_s12] sm:$0xff] %vm1468_vm4, %v2064_v55  ;;  %v1891_v8 = vld [vmem:[%s4056_s12 + $0xf8] sm:$0xff]  ;;  %v2021_v34 = vmul.f32 1.442695, %v1944_v13  ;;  %v1949_v61 = vsub.f32 %v1894_v49, %v3547_v46  ;;  %v1898_v11 = vld [vmem:[%s4056_s12 + $0x130] sm:$0xff] }
 0x4e7   : > { %2445 = vmatprep.subr.mxu0 %v2788_v33  ;;  %v2660_v26 = vpop.eup %2659  ;;  %2685 = vpow2.f32 %v1997_v62  ;;  %v2067_v32 = vmul.f32 %v2658_v23, %v3667_v54  ;;  %2113 = vst.msk [vmem:[%s4056_s12 + $0x8] sm:$0xff] %vm1468_vm4, %v2065_v28  ;;  %v1946_v43 = vsub.f32 %v1891_v8, %v3547_v46  ;;  %v2023_v12 = vmul.f32 1.442695, %v1945_v0  ;;  %v1899_v23 = vld [vmem:[%s4056_s12 + $0x138] sm:$0xff] }
 0x4e8   : > { %2446 = vmatpush3.msra.mxu0 %v1774_v9  ;;  %v2662_v45 = vpop.eup %2661  ;;  %2687 = vpow2.f32 %v1999_v17  ;;  %v2068_v35 = vmul.f32 %v2660_v26, %v3667_v54  ;;  %2114 = vst.msk [vmem:[%s4056_s12 + $0x10] sm:$0xff] %vm1468_vm4, %v2066_v3  ;;  %v2013_v9 = vmul.f32 1.442695, %v1940_v2  ;;  %v1950_v15 = vsub.f32 %v1895_v57, %v3547_v46  ;;  %v1900_v26 = vld [vmem:[%s4056_s12 + $0x140] sm:$0xff] }
 0x4e9   : > { %2447 = vmatprep.subr.mxu0 %v2788_v33  ;;  %v2664_v25 = vpop.eup %2663  ;;  %2689 = vpow2.f32 %v2001_v20  ;;  %v2069_v51 = vmul.f32 %v2662_v45, %v3667_v54  ;;  %2115 = vst.msk [vmem:[%s4056_s12 + $0x18] sm:$0xff] %vm1468_vm4, %v2067_v32  ;;  %v2025_v29 = vmul.f32 1.442695, %v1946_v43  ;;  %v1951_v40 = vsub.f32 %v1896_v1, %v3547_v46  ;;  %v1901_v45 = vld [vmem:[%s4056_s12 + $0x148] sm:$0xff] }
 0x4ea   : > { %2448 = vmatpush3.msra.mxu0 %v1773_v50  ;;  %v2666_v37 = vpop.eup %2665  ;;  %2691 = vpow2.f32 %v2003_v10  ;;  %v2070_v18 = vmul.f32 %v2664_v25, %v3667_v54  ;;  %2116 = vst.msk [vmem:[%s4056_s12 + $0x20] sm:$0xff] %vm1468_vm4, %v2068_v35  ;;  %v2029_v2 = vmul.f32 1.442695, %v1948_v6  ;;  %v1953_v21 = vsub.f32 %v1898_v11, %v3547_v46  ;;  %v1902_v25 = vld [vmem:[%s4056_s12 + $0x150] sm:$0xff] }
 0x4eb   : > { %2449 = vmatprep.subr.mxu0 %v2788_v33  ;;  %v2668_v47 = vpop.eup %2667  ;;  %2693 = vpow2.f32 %v2005_v14  ;;  %v2071_v22 = vmul.f32 %v2666_v37, %v3667_v54  ;;  %2117 = vst.msk [vmem:[%s4056_s12 + $0x28] sm:$0xff] %vm1468_vm4, %v2069_v51  ;;  %v2031_v24 = vmul.f32 1.442695, %v1949_v61  ;;  %v1954_v31 = vsub.f32 %v1899_v23, %v3547_v46  ;;  %v1903_v37 = vld [vmem:[%s4056_s12 + $0x158] sm:$0xff] }
 0x4ec   : > { %2450 = vmatpush3.msra.mxu0 %v1772_v60  ;;  %v2670_v41 = vpop.eup %2669  ;;  %2695 = vpow2.f32 %v2007_v58  ;;  %v2072_v42 = vmul.f32 %v2668_v47, %v3667_v54  ;;  %2118 = vst.msk [vmem:[%s4056_s12 + $0x30] sm:$0xff] %vm1468_vm4, %v2070_v18  ;;  %v1947_v60 = vsub.f32 %v1892_v5, %v3547_v46  ;;  %v2033_v52 = vmul.f32 1.442695, %v1950_v15  ;;  %v1904_v47 = vld [vmem:[%s4056_s12 + $0x160] sm:$0xff] }
 0x4ed   : > { %2451 = vmatprep.subr.mxu0 %v2788_v33  ;;  %v1888_v33 = vld [vmem:[%s4056_s12 + $0xe0] sm:$0xff]  ;;  %v2672_v50 = vpop.eup %2671  ;;  %2697 = vpow2.f32 %v2009_v53  ;;  %v2073_v59 = vmul.f32 %v2670_v41, %v3667_v54  ;;  %2119 = vst.msk [vmem:[%s4056_s12 + $0x38] sm:$0xff] %vm1468_vm4, %v2071_v22  ;;  %v1955_v8 = vsub.f32 %v1900_v26, %v3547_v46  ;;  %v1956_v5 = vsub.f32 %v1901_v45, %v3547_v46  ;;  %v1905_v41 = vld [vmem:[%s4056_s12 + $0x168] sm:$0xff] }
 0x4ee   : > { %2452 = vmatpush3.msra.mxu0 %v1771_v4  ;;  %v1943_v27 = vsub.f32 %v1888_v33, %v3547_v46  ;;  %v2674_v36 = vpop.eup %2673  ;;  %2699 = vpow2.f32 %v2011_v56  ;;  %v2074_v19 = vmul.f32 %v2672_v50, %v3667_v54  ;;  %2120 = vst.msk [vmem:[%s4056_s12 + $0x40] sm:$0xff] %vm1468_vm4, %v2072_v42  ;;  %v2027_v44 = vmul.f32 1.442695, %v1947_v60  ;;  %v1906_v50 = vld [vmem:[%s4056_s12 + $0x170] sm:$0xff] }
 0x4ef   : > { %v2676_v63 = vpop.eup %2675  ;;  %2701 = vpow2.f32 %v2013_v9  ;;  %v2075_v62 = vmul.f32 %v2674_v36, %v3667_v54  ;;  %2121 = vst.msk [vmem:[%s4056_s12 + $0x48] sm:$0xff] %vm1468_vm4, %v2073_v59  ;;  %v1952_v33 = vsub.f32 %v1897_v7, %v3547_v46  ;;  %v1957_v16 = vsub.f32 %v1902_v25, %v3547_v46  ;;  %v1907_v36 = vld [vmem:[%s4056_s12 + $0x178] sm:$0xff] }
 0x4f0   : > { %v2019_v39 = vmul.f32 1.442695, %v1943_v27  ;;  %v2678_v4 = vpop.eup %2677  ;;  %2703 = vpow2.f32 %v2015_v30  ;;  %v2076_v17 = vmul.f32 %v2676_v63, %v3667_v54  ;;  %2122 = vst.msk [vmem:[%s4056_s12 + $0x50] sm:$0xff] %vm1468_vm4, %v2074_v19  ;;  %v2035_v27 = vmul.f32 1.442695, %v1951_v40 }
 0x4f1   : > { %v2680_v55 = vpop.eup %2679  ;;  %2705 = vpow2.f32 %v2017_v48  ;;  %v2077_v20 = vmul.f32 %v2678_v4, %v3667_v54  ;;  %2123 = vst.msk [vmem:[%s4056_s12 + $0x58] sm:$0xff] %vm1468_vm4, %v2075_v62  ;;  %v2037_v13 = vmul.f32 1.442695, %v1952_v33  ;;  %v2039_v0 = vmul.f32 1.442695, %v1953_v21 }
 0x4f2   : > { %v2682_v28 = vpop.eup %2681  ;;  %2707 = vpow2.f32 %v2019_v39  ;;  %v2078_v10 = vmul.f32 %v2680_v55, %v3667_v54  ;;  %2124 = vst.msk [vmem:[%s4056_s12 + $0x60] sm:$0xff] %vm1468_vm4, %v2076_v17  ;;  %v1958_v49 = vsub.f32 %v1903_v37, %v3547_v46  ;;  %v2041_v43 = vmul.f32 1.442695, %v1954_v31 }
 0x4f3   : > { %v2684_v3 = vpop.eup %2683  ;;  %2709 = vpow2.f32 %v2021_v34  ;;  %v2079_v14 = vmul.f32 %v2682_v28, %v3667_v54  ;;  %2125 = vst.msk [vmem:[%s4056_s12 + $0x68] sm:$0xff] %vm1468_vm4, %v2077_v20  ;;  %v1959_v57 = vsub.f32 %v1904_v47, %v3547_v46  ;;  %v2043_v60 = vmul.f32 1.442695, %v1955_v8 }
 0x4f4   : > { %v2686_v32 = vpop.eup %2685  ;;  %2711 = vpow2.f32 %v2023_v12  ;;  %v2080_v58 = vmul.f32 %v2684_v3, %v3667_v54  ;;  %2126 = vst.msk [vmem:[%s4056_s12 + $0x70] sm:$0xff] %vm1468_vm4, %v2078_v10  ;;  %v1960_v63 = vsub.f32 %v1905_v41, %v3547_v46  ;;  %v2045_v1 = vmul.f32 1.442695, %v1956_v5 }
 0x4f5   : > { %v2688_v35 = vpop.eup %2687  ;;  %2713 = vpow2.f32 %v2025_v29  ;;  %v2081_v53 = vmul.f32 %v2686_v32, %v3667_v54  ;;  %2127 = vst.msk [vmem:[%s4056_s12 + $0x78] sm:$0xff] %vm1468_vm4, %v2079_v14  ;;  %v1961_v62 = vsub.f32 %v1906_v50, %v3547_v46  ;;  %v2047_v4 = vmul.f32 1.442695, %v1957_v16 }
 0x4f6   : > { %v2690_v51 = vpop.eup %2689  ;;  %2715 = vpow2.f32 %v2027_v44  ;;  %v2082_v56 = vmul.f32 %v2688_v35, %v3667_v54  ;;  %2128 = vst.msk [vmem:[%s4056_s12 + $0x80] sm:$0xff] %vm1468_vm4, %v2080_v58  ;;  %v1962_v12 = vsub.f32 %v1907_v36, %v3547_v46  ;;  %v2049_v17 = vmul.f32 1.442695, %v1958_v49 }
 0x4f7   : > { %v2692_v18 = vpop.eup %2691  ;;  %2717 = vpow2.f32 %v2029_v2  ;;  %v2083_v9 = vmul.f32 %v2690_v51, %v3667_v54  ;;  %2129 = vst.msk [vmem:[%s4056_s12 + $0x88] sm:$0xff] %vm1468_vm4, %v2081_v53  ;;  %v2051_v15 = vmul.f32 1.442695, %v1959_v57  ;;  %v2053_v20 = vmul.f32 1.442695, %v1960_v63 }
 0x4f8   : > { %v2694_v22 = vpop.eup %2693  ;;  %2719 = vpow2.f32 %v2031_v24  ;;  %v2084_v30 = vmul.f32 %v2692_v18, %v3667_v54  ;;  %2130 = vst.msk [vmem:[%s4056_s12 + $0x90] sm:$0xff] %vm1468_vm4, %v2082_v56  ;;  %v2055_v40 = vmul.f32 1.442695, %v1961_v62  ;;  %v2057_v3 = vmul.f32 1.442695, %v1962_v12 }
 0x4f9   : > { %v2696_v42 = vpop.eup %2695  ;;  %2721 = vpow2.f32 %v2033_v52  ;;  %v2085_v48 = vmul.f32 %v2694_v22, %v3667_v54  ;;  %2131 = vst.msk [vmem:[%s4056_s12 + $0x98] sm:$0xff] %vm1468_vm4, %v2083_v9  ;;  %v1760_v57 = vld [vmem:[#allocation4] sm:$0x1] }
 0x4fa   : > { %v2698_v59 = vpop.eup %2697  ;;  %2723 = vpow2.f32 %v2035_v27  ;;  %v2086_v39 = vmul.f32 %v2696_v42, %v3667_v54  ;;  %2132 = vst.msk [vmem:[%s4056_s12 + $0xa0] sm:$0xff] %vm1468_vm4, %v2084_v30 }
 0x4fb   : > { %v2700_v19 = vpop.eup %2699  ;;  %2725 = vpow2.f32 %v2037_v13  ;;  %v2087_v6 = vmul.f32 %v2698_v59, %v3667_v54  ;;  %2133 = vst.msk [vmem:[%s4056_s12 + $0xa8] sm:$0xff] %vm1468_vm4, %v2085_v48 }
 0x4fc   : > { %v2702_v34 = vpop.eup %2701  ;;  %2727 = vpow2.f32 %v2039_v0  ;;  %v2088_v7 = vmul.f32 %v2700_v19, %v3667_v54  ;;  %2134 = vst.msk [vmem:[%s4056_s12 + $0xb0] sm:$0xff] %vm1468_vm4, %v2086_v39  ;;  %v1787_v19 = vld [vmem:[%s4054_s10] sm:$0x1] }
 0x4fd   : > { %v2704_v61 = vpop.eup %2703  ;;  %2729 = vpow2.f32 %v2041_v43  ;;  %v2089_v55 = vmul.f32 %v2702_v34, %v3667_v54  ;;  %2135 = vst.msk [vmem:[%s4056_s12 + $0xb8] sm:$0xff] %vm1468_vm4, %v2087_v6 }
 0x4fe   : > { %v2706_v11 = vpop.eup %2705  ;;  %2731 = vpow2.f32 %v2043_v60  ;;  %v2090_v29 = vmul.f32 %v2704_v61, %v3667_v54  ;;  %2136 = vst.msk [vmem:[%s4056_s12 + $0xc0] sm:$0xff] %vm1468_vm4, %v2088_v7 }
 0x4ff   : > { %v2708_v46 = vpop.eup %2707  ;;  %2733 = vpow2.f32 %v2045_v1  ;;  %v2091_v28 = vmul.f32 %v2706_v11, %v3667_v54  ;;  %2137 = vst.msk [vmem:[%s4056_s12 + $0xc8] sm:$0xff] %vm1468_vm4, %v2089_v55 }
 0x500   : > { %v2710_v23 = vpop.eup %2709  ;;  %2735 = vpow2.f32 %v2047_v4  ;;  %v2092_v44 = vmul.f32 %v2708_v46, %v3667_v54  ;;  %2138 = vst.msk [vmem:[%s4056_s12 + $0xd0] sm:$0xff] %vm1468_vm4, %v2090_v29 }
 0x501   : > { %v2712_v10 = vpop.eup %2711  ;;  %2737 = vpow2.f32 %v2049_v17  ;;  %v2093_v26 = vmul.f32 %v2710_v23, %v3667_v54  ;;  %2139 = vst.msk [vmem:[%s4056_s12 + $0xd8] sm:$0xff] %vm1468_vm4, %v2091_v28 }
 0x502   : > { %v2714_v33 = vpop.eup %2713  ;;  %2739 = vpow2.f32 %v2051_v15  ;;  %v2094_v2 = vmul.f32 %v2712_v10, %v3667_v54  ;;  %2140 = vst.msk [vmem:[%s4056_s12 + $0xe0] sm:$0xff] %vm1468_vm4, %v2092_v44 }
 0x503   : > { %v2716_v14 = vpop.eup %2715  ;;  %2741 = vpow2.f32 %v2053_v20  ;;  %v2095_v32 = vmul.f32 %v2714_v33, %v3667_v54  ;;  %2141 = vst.msk [vmem:[%s4056_s12 + $0xe8] sm:$0xff] %vm1468_vm4, %v2093_v26 }
 0x504   : > { %v2718_v45 = vpop.eup %2717  ;;  %2743 = vpow2.f32 %v2055_v40  ;;  %v2096_v21 = vmul.f32 %v2716_v14, %v3667_v54  ;;  %2142 = vst.msk [vmem:[%s4056_s12 + $0xf0] sm:$0xff] %vm1468_vm4, %v2094_v2 }
 0x505   : > { %v2720_v24 = vpop.eup %2719  ;;  %2745 = vpow2.f32 %v2057_v3  ;;  %v2097_v58 = vmul.f32 %v2718_v45, %v3667_v54  ;;  %2143 = vst.msk [vmem:[%s4056_s12 + $0xf8] sm:$0xff] %vm1468_vm4, %v2095_v32 }
 0x506   : > { %v2722_v35 = vpop.eup %2721  ;;  %v2098_v25 = vmul.f32 %v2720_v24, %v3667_v54  ;;  %2144 = vst.msk [vmem:[%s4056_s12 + $0x100] sm:$0xff] %vm1468_vm4, %v2096_v21 }
 0x507   : > { %v2724_v31 = vpop.eup %2723  ;;  %v2099_v52 = vmul.f32 %v2722_v35, %v3667_v54  ;;  %2145 = vst.msk [vmem:[%s4056_s12 + $0x108] sm:$0xff] %vm1468_vm4, %v2097_v58 }
 0x508   : > { %v2726_v53 = vpop.eup %2725  ;;  %v2100_v51 = vmul.f32 %v2724_v31, %v3667_v54  ;;  %2146 = vst.msk [vmem:[%s4056_s12 + $0x110] sm:$0xff] %vm1468_vm4, %v2098_v25 }
 0x509   : > { %v2728_v37 = vpop.eup %2727  ;;  %v2101_v8 = vmul.f32 %v2726_v53, %v3667_v54  ;;  %2147 = vst.msk [vmem:[%s4056_s12 + $0x118] sm:$0xff] %vm1468_vm4, %v2099_v52 }
 0x50a   : > { %v2730_v27 = vpop.eup %2729  ;;  %v2102_v56 = vmul.f32 %v2728_v37, %v3667_v54  ;;  %2148 = vst.msk [vmem:[%s4056_s12 + $0x120] sm:$0xff] %vm1468_vm4, %v2100_v51 }
 0x50b   : > { %v2732_v18 = vpop.eup %2731  ;;  %v2103_v47 = vmul.f32 %v2730_v27, %v3667_v54  ;;  %2149 = vst.msk [vmem:[%s4056_s12 + $0x128] sm:$0xff] %vm1468_vm4, %v2101_v8 }
 0x50c   : > { %v2734_v5 = vpop.eup %2733  ;;  %v2104_v13 = vmul.f32 %v2732_v18, %v3667_v54  ;;  %2150 = vst.msk [vmem:[%s4056_s12 + $0x130] sm:$0xff] %vm1468_vm4, %v2102_v56 }
 0x50d   : > { %v2736_v9 = vpop.eup %2735  ;;  %v2105_v22 = vmul.f32 %v2734_v5, %v3667_v54  ;;  %2151 = vst.msk [vmem:[%s4056_s12 + $0x138] sm:$0xff] %vm1468_vm4, %v2103_v47 }
 0x50e   : > { %v2738_v41 = vpop.eup %2737  ;;  %v2106_v16 = vmul.f32 %v2736_v9, %v3667_v54  ;;  %2152 = vst.msk [vmem:[%s4056_s12 + $0x140] sm:$0xff] %vm1468_vm4, %v2104_v13 }
 0x50f   : > { %v2740_v0 = vpop.eup %2739  ;;  %v2107_v30 = vmul.f32 %v2738_v41, %v3667_v54  ;;  %2153 = vst.msk [vmem:[%s4056_s12 + $0x148] sm:$0xff] %vm1468_vm4, %v2105_v22 }
 0x510   : > { %v2742_v42 = vpop.eup %2741  ;;  %v2108_v50 = vmul.f32 %v2740_v0, %v3667_v54  ;;  %2154 = vst.msk [vmem:[%s4056_s12 + $0x150] sm:$0xff] %vm1468_vm4, %v2106_v16 }
 0x511   : > { %v2744_v49 = vpop.eup %2743  ;;  %v2109_v43 = vmul.f32 %v2742_v42, %v3667_v54  ;;  %2155 = vst.msk [vmem:[%s4056_s12 + $0x158] sm:$0xff] %vm1468_vm4, %v2107_v30 }
 0x512   : > { %v2746_v48 = vpop.eup %2745  ;;  %v2110_v59 = vmul.f32 %v2744_v49, %v3667_v54  ;;  %2156 = vst.msk [vmem:[%s4056_s12 + $0x160] sm:$0xff] %vm1468_vm4, %v2108_v50 }
 0x513   : > { %v2111_v36 = vmul.f32 %v2746_v48, %v3667_v54  ;;  %2157 = vst.msk [vmem:[%s4056_s12 + $0x168] sm:$0xff] %vm1468_vm4, %v2109_v43 }
 0x514   : > { %2158 = vst.msk [vmem:[%s4056_s12 + $0x170] sm:$0xff] %vm1468_vm4, %v2110_v59 }
 0x515   : > { %2159 = vst.msk [vmem:[%s4056_s12 + $0x178] sm:$0xff] %vm1468_vm4, %v2111_v36 }
 0x558   : > { %v1764_v60 = vpop.permute.xlu0 %1763 }
 0x559   : > { %v1769_v39 = vrot.slane %v1764_v60, %v2965_v38 }
 0x55b   : > { %v1770_v54 = vmul.f32 %v1769_v39, %v1760_v57 }
 0x55d   : > { %2454 = vmatmul.mubr.f32.vlgmr.msra.gmra.mxu0 %v1770_v54 }
 0x61d   : > { %v1854_v63 = vpop.f32.mrf.mxu0 }
 0x61e   : > { %v1855_v1 = vadd.f32 %v1854_v63, %v1787_v19 }
 0x61f   : > { %v2455_v6 = vpop.f32.mrf.mxu0 }
 0x620   : > { %1859 = vst.msk [vmem:[#allocation6] sm:$0x1] %vm1858_vm7, %v1855_v1 }
 0x621 PF: > { %p2460_p6 = scmp.eq.s32.totalorder %s2865_s24, 2  ;;  %s2790_s18 = smov [#allocation6]  }
 0x622   : > { %s2167_s19 = sshll.u32 %s2790_s18, 4  ;;  %s2168_s19 = int_to_ptr.vmem [resolvable:$true] %s2167_s19 }
 0x623   : > { %s2747_s20 = scalar_lea.vmem %s2168_s19, 16  ;;  %s2753_s21 = scalar_lea.vmem %s2168_s19, 32 }
 0x624   : > { %p2748_p7 = scmp.ne.s32.totalorder %s2168_s19, %s2747_s20  ;;  %p2754_p10 = scmp.lt.s32.totalorder %s2168_s19, %s2168_s19 }
 0x625   : > { %p2755_p11 = scmp.lt.s32.totalorder %s2753_s21, %s2747_s20 }
 0x626   : > { %p2749_p8 = pnand %p2748_p7, %p2460_p6 }
 0x627   : > { %p2756_p12 = por %p2755_p11, %p2754_p10 }
 0x628   : > { %p2750_p9 = pneg %p2749_p8 }
 0x62a   : > { %p2757_p13 = pnand %p2756_p12, %p2750_p9 }
 0x62c   : > { %2760 = shalt.err (!%p2757_p13)
}
 0x62d   : > { %2457 = dma.vmem_to_hbm [thread:$0]  (%p2460_p6), %s2168_s19, 16, %s4055_s11, [#allocation7]  }
 0x62e   : > { %2776 = dma.done.wait (%p2460_p6), [#allocation7], 16  }
 0x62f   : > { %2778 = vsyncadd (%p2460_p6), [#allocation7], 4294967280 }
 0x630 PF: > { %s26_s23 = sadd.s32 1, %s2781_s23  }
 0x631   : > { %p23_p0 = scmp.ge.s32.totalorder %s26_s23, 5  }
 0x633   :  { %25 = sbr.rel (!%p23_p0) target bundleno = 4 (0x4), region = 108 }
 0x638   :  { %2186 = vsyncpa [#allocation7], 1 }
 0x639   :  { %2188 = vsyncpa [#allocation7 + $0x1], 1 }

</bundles_post_ra>
